<compile_context>
chip_gen: v7x
topology: tpu7x:2x2x1
jax: 0.10.0
libtpu: 0.0.40
codegen_flags: <defaults>
</compile_context>

<pallas_src>
import jax
import jax.numpy as jnp
from jax.experimental import pallas as pl
from jax.experimental.pallas import tpu as pltpu


# ---------------------------------------------------------------------------
# Kernel 1: conv1/relu/pool -> conv2/relu/pool -> conv3/relu/pool
# One batch element per grid step ("parallel" axis).
# ---------------------------------------------------------------------------
def _conv_stack_kernel(x_ref,
                       w1_ref, b1_ref,
                       w2_ref, b2_ref,
                       w3_ref, b3_ref,
                       h_ref):
    def conv_relu_pool(x2d, w_ref, b_ref):
        # x2d: (L, Cin) f32, w_ref: (3*Cin, Cout) bf16, b_ref: (1, Cout) f32
        L, Cin = x2d.shape
        Cout = w_ref.shape[1]
        zero = jnp.zeros((1, Cin), jnp.float32)
        x_prev = jnp.concatenate([zero, x2d[:-1, :]], axis=0)   # x[t-1]  (tap k=0)
        x_next = jnp.concatenate([x2d[1:, :], zero], axis=0)    # x[t+1]  (tap k=2)
        # Fuse the three taps into one K = 3*Cin MXU contraction.
        xcat = jnp.concatenate([x_prev, x2d, x_next], axis=-1)  # (L, 3*Cin)
        y = jnp.dot(xcat.astype(jnp.bfloat16), w_ref[...],
                    preferred_element_type=jnp.float32)         # (L, Cout)
        y = jnp.maximum(y + b_ref[...], 0.0)                    # bias + ReLU
        # MaxPool1d(kernel_size=2, stride=2) with PyTorch floor semantics.
        Lp = (L // 2) * 2
        return jnp.max(y[:Lp].reshape(Lp // 2, 2, Cout), axis=1)  # (L//2, Cout)

    x = x_ref[0].astype(jnp.float32)                 # (L, Cin)
    h = conv_relu_pool(x, w1_ref, b1_ref)            # (L//2,  64)
    h = conv_relu_pool(h, w2_ref, b2_ref)            # (L//4, 128)
    h = conv_relu_pool(h, w3_ref, b3_ref)            # (L//8, 256)
    h_ref[0] = h


# ---------------------------------------------------------------------------
# Kernel 2: fc1 (K-tiled, f32 accumulator) -> ReLU -> fc2 (epilogue)
# Grid axis = fc1 reduction (K) axis, "arbitrary".
# ---------------------------------------------------------------------------
def _fc_kernel(hflat_ref, w1_ref, b1_ref, w2_ref, b2_ref, out_ref, acc_ref):
    k = pl.program_id(0)

    @pl.when(k == 0)
    def _():
        acc_ref[...] = jnp.zeros_like(acc_ref)

    acc_ref[...] += jnp.dot(hflat_ref[...].astype(jnp.bfloat16), w1_ref[...],
                            preferred_element_type=jnp.float32)

    @pl.when(k == pl.num_programs(0) - 1)
    def _():
        h1 = jnp.maximum(acc_ref[...] + b1_ref[...], 0.0)       # ReLU(fc1)
        logits = jnp.dot(h1.astype(jnp.bfloat16), w2_ref[...],
                         preferred_element_type=jnp.float32)    # fc2
        out_ref[...] = logits + b2_ref[...]


def _round_up(n, m):
    return ((n + m - 1) // m) * m


def enhanced_cnn1d_forward(x_ncl, params, *, k_block_rows=8192):
    """x_ncl: (B, Cin, L) float32, PyTorch NCL layout. Returns (B, num_classes)."""
    x = jnp.transpose(x_ncl, (0, 2, 1)).astype(jnp.float32)     # (B, L, Cin)
    B, L, Cin = x.shape
    L1, L2, L3 = L // 2, L // 4, L // 8                          # floor pooling x3
    hidden = params["b_fc1"].shape[0]                            # 256
    num_classes = params["b_fc2"].shape[0]
    nc_pad = pl.cdiv(num_classes, 128) * 128                     # lane-dense fc2 out
    c3 = params["w_conv3"].shape[0]                              # 256
    flatten = L3 * c3
    vmem_limit = 48 * 1024 * 1024                                # fits v5e/v6e/v7x

    # Conv1d weight (Cout, Cin, 3) -> fused (3*Cin, Cout), bf16.
    def fuse_conv_w(w):
        kk, ci, co = w.shape[2], w.shape[1], w.shape[0]
        return jnp.transpose(w, (2, 1, 0)).reshape(kk * ci, co).astype(jnp.bfloat16)

    w1f = fuse_conv_w(params["w_conv1"])
    w2f = fuse_conv_w(params["w_conv2"])
    w3f = fuse_conv_w(params["w_conv3"])
    b1 = params["b_conv1"].reshape(1, -1).astype(jnp.float32)
    b2 = params["b_conv2"].reshape(1, -1).astype(jnp.float32)
    b3 = params["b_conv3"].reshape(1, -1).astype(jnp.float32)

    conv_flops = 2 * B * (L * 3 * Cin * 64 + L1 * 3 * 64 * 128 + L2 * 3 * 128 * 256)
    conv_bytes = (x.size * 4 + (w1f.size + w2f.size + w3f.size) * 2
                  + (b1.size + b2.size + b3.size) * 4 + B * flatten * 4)

    h = pl.pallas_call(
        _conv_stack_kernel,
        out_shape=jax.ShapeDtypeStruct((B, L3, c3), jnp.float32),
        grid=(B,),
        in_specs=[
            pl.BlockSpec((1, L, Cin), lambda b: (b, 0, 0)),
            pl.BlockSpec(w1f.shape, lambda b: (0, 0)),
            pl.BlockSpec(b1.shape, lambda b: (0, 0)),
            pl.BlockSpec(w2f.shape, lambda b: (0, 0)),
            pl.BlockSpec(b2.shape, lambda b: (0, 0)),
            pl.BlockSpec(w3f.shape, lambda b: (0, 0)),
            pl.BlockSpec(b3.shape, lambda b: (0, 0)),
        ],
        out_specs=pl.BlockSpec((1, L3, c3), lambda b: (b, 0, 0)),
        compiler_params=pltpu.CompilerParams(
            dimension_semantics=("parallel",),
            vmem_limit_bytes=vmem_limit),
        cost_estimate=pl.CostEstimate(flops=conv_flops, transcendentals=0,
                                      bytes_accessed=conv_bytes),
    )(x, w1f, b1, w2f, b2, w3f, b3)

    # fc1 weight: PyTorch flatten index = c*L3 + l  ->  K-rows ordered l*c3 + c
    # so that h.reshape(B, L3*c3) matches without any in-kernel permutation.
    w_fc1 = jnp.transpose(params["w_fc1"].reshape(hidden, c3, L3),
                          (2, 1, 0)).reshape(flatten, hidden).astype(jnp.bfloat16)
    b_fc1 = params["b_fc1"].reshape(1, -1).astype(jnp.float32)
    w_fc2 = jnp.zeros((hidden, nc_pad), jnp.bfloat16).at[:, :num_classes].set(
        jnp.transpose(params["w_fc2"], (1, 0)).astype(jnp.bfloat16))
    b_fc2 = jnp.zeros((1, nc_pad), jnp.float32).at[0, :num_classes].set(
        params["b_fc2"].astype(jnp.float32))

    hflat = h.reshape(B, flatten)

    # K-block: any multiple of 128; zero-pad the reduction axis up to a multiple
    # of it (padded rows contribute exactly zero to the accumulation).
    k_blk = max(128, (min(k_block_rows, flatten) // 128) * 128)
    flatten_pad = _round_up(flatten, k_blk)
    if flatten_pad != flatten:
        hflat = jnp.pad(hflat, ((0, 0), (0, flatten_pad - flatten)))
        w_fc1 = jnp.pad(w_fc1, ((0, flatten_pad - flatten), (0, 0)))
    grid_k = flatten_pad // k_blk

    fc_flops = 2 * B * flatten_pad * hidden + 2 * B * hidden * nc_pad
    fc_bytes = (B * flatten_pad * 4 + flatten_pad * hidden * 2 + hidden * nc_pad * 2
                + (hidden + nc_pad) * 4 + B * nc_pad * 4)

    out = pl.pallas_call(
        _fc_kernel,
        out_shape=jax.ShapeDtypeStruct((B, nc_pad), jnp.float32),
        grid=(grid_k,),
        in_specs=[
            pl.BlockSpec((B, k_blk), lambda k: (0, k)),
            pl.BlockSpec((k_blk, hidden), lambda k: (k, 0)),
            pl.BlockSpec((1, hidden), lambda k: (0, 0)),
            pl.BlockSpec((hidden, nc_pad), lambda k: (0, 0)),
            pl.BlockSpec((1, nc_pad), lambda k: (0, 0)),
        ],
        out_specs=pl.BlockSpec((B, nc_pad), lambda k: (0, 0)),
        scratch_shapes=[pltpu.VMEM((B, hidden), jnp.float32)],
        compiler_params=pltpu.CompilerParams(
            dimension_semantics=("arbitrary",),
            vmem_limit_bytes=vmem_limit),
        cost_estimate=pl.CostEstimate(flops=fc_flops, transcendentals=0,
                                      bytes_accessed=fc_bytes),
    )(hflat, w_fc1, b_fc1, w_fc2, b_fc2)

    return out[:, :num_classes]


def init_params(key, in_channels, num_classes, input_length):
    """Deterministic PyTorch-shaped parameters (uniform +-1/sqrt(fan_in))."""
    L3 = input_length // 8
    flatten_size = 256 * L3
    shapes = {
        "w_conv1": (64, in_channels, 3), "b_conv1": (64,),
        "w_conv2": (128, 64, 3),         "b_conv2": (128,),
        "w_conv3": (256, 128, 3),        "b_conv3": (256,),
        "w_fc1": (256, flatten_size),    "b_fc1": (256,),
        "w_fc2": (num_classes, 256),     "b_fc2": (num_classes,),
    }
    fan_in = {
        "w_conv1": in_channels * 3, "b_conv1": in_channels * 3,
        "w_conv2": 64 * 3,          "b_conv2": 64 * 3,
        "w_conv3": 128 * 3,         "b_conv3": 128 * 3,
        "w_fc1": flatten_size,      "b_fc1": flatten_size,
        "w_fc2": 256,               "b_fc2": 256,
    }
    params = {}
    for name, shape in shapes.items():
        key, sub = jax.random.split(key)
        bound = 1.0 / jnp.sqrt(jnp.float32(fan_in[name]))
        params[name] = jax.random.uniform(sub, shape, jnp.float32, -bound, bound)
    return params


def reference_forward(x_ncl, params):
    """Plain-JAX mirror of the PyTorch forward (NCL layout) for validation."""
    def conv1d(x, w, b):
        xp = jnp.pad(x, ((0, 0), (0, 0), (1, 1)))
        L = x.shape[2]
        out = sum(jnp.einsum("oc,bcl->bol", w[:, :, k], xp[:, :, k:k + L])
                  for k in range(3))
        return out + b[None, :, None]

    h = x_ncl.astype(jnp.float32)
    for wk, bk in [("w_conv1", "b_conv1"), ("w_conv2", "b_conv2"),
                   ("w_conv3", "b_conv3")]:
        h = jax.nn.relu(conv1d(h, params[wk], params[bk]))
        B, C, L = h.shape
        Lp = (L // 2) * 2
        h = jnp.max(h[:, :, :Lp].reshape(B, C, Lp // 2, 2), axis=3)
    flat = h.reshape(h.shape[0], -1)                       # channel-major flatten
    h1 = jax.nn.relu(flat @ params["w_fc1"].T + params["b_fc1"])
    return h1 @ params["w_fc2"].T + params["b_fc2"]


if __name__ == "__main__":
    # Small, forward-consistent shapes (original uses input_length=7500;
    # flatten_size is derived from the length the same way).
    def run_case(B, CIN, L, NUM_CLASSES, k_block_rows):
        key = jax.random.PRNGKey(0)
        key, xkey = jax.random.split(key)
        x = jax.random.normal(xkey, (B, CIN, L), jnp.float32)   # PyTorch NCL input
        params = init_params(key, CIN, NUM_CLASSES, L)

        fwd = jax.jit(lambda xx, pp: enhanced_cnn1d_forward(
            xx, pp, k_block_rows=k_block_rows))
        out = jax.block_until_ready(fwd(x, params))

        # Reference with bf16-rounded weights (the kernel streams weights in
        # bf16, accumulating in f32); biases stay f32 in both.
        params_q = {name: (v.astype(jnp.bfloat16).astype(jnp.float32)
                           if name.startswith("w_") else v)
                    for name, v in params.items()}
        ref = jax.block_until_ready(reference_forward(x, params_q))

        assert out.shape == (B, NUM_CLASSES), out.shape
        assert jnp.allclose(out, ref, rtol=2e-2, atol=2e-2), (out, ref)

    # Case 1: exercises the fc1 K-reduction grid (2048 / 512 = 4 steps).
    run_case(2, 4, 64, 5, k_block_rows=512)
    # Case 2: odd intermediate length (20->10->5->2, floor pooling) plus a
    # K block (384) that does not divide flatten (512) -> zero-pad path.
    run_case(2, 4, 20, 5, k_block_rows=384)
    print("KERNEL_OK")
</pallas_src>

<mosaic_0001>
module attributes {stable_mosaic.version = 11 : i64} {
  func.func @_conv_stack_kernel(%arg0: i32, %arg1: memref<1x64x4xf32, #tpu.memory_space<vmem>>, %arg2: memref<12x64xbf16, #tpu.memory_space<vmem>>, %arg3: memref<1x64xf32, #tpu.memory_space<vmem>>, %arg4: memref<192x128xbf16, #tpu.memory_space<vmem>>, %arg5: memref<1x128xf32, #tpu.memory_space<vmem>>, %arg6: memref<384x256xbf16, #tpu.memory_space<vmem>>, %arg7: memref<1x256xf32, #tpu.memory_space<vmem>>, %arg8: memref<1x8x256xf32, #tpu.memory_space<vmem>>) attributes {dimension_semantics = [#tpu.dimension_semantics<parallel>], iteration_bounds = array<i64: 2>, scalar_prefetch = 0 : i64, scratch_operands = 0 : i64, tpu.core_type = #tpu.core_type<tc>, window_params = [{transform_indices = @transform_0, window_bounds = array<i64: 1, 64, 4>}, {pipeline_mode = #tpu.pipeline_mode<synchronous>, transform_indices = @transform_1, window_bounds = array<i64: 12, 64>}, {pipeline_mode = #tpu.pipeline_mode<synchronous>, transform_indices = @transform_2, window_bounds = array<i64: 1, 64>}, {pipeline_mode = #tpu.pipeline_mode<synchronous>, transform_indices = @transform_3, window_bounds = array<i64: 192, 128>}, {pipeline_mode = #tpu.pipeline_mode<synchronous>, transform_indices = @transform_4, window_bounds = array<i64: 1, 128>}, {pipeline_mode = #tpu.pipeline_mode<synchronous>, transform_indices = @transform_5, window_bounds = array<i64: 384, 256>}, {pipeline_mode = #tpu.pipeline_mode<synchronous>, transform_indices = @transform_6, window_bounds = array<i64: 1, 256>}, {transform_indices = @transform_7, window_bounds = array<i64: 1, 8, 256>}]} {
    %c0 = arith.constant 0 : index
    %c0_0 = arith.constant 0 : index
    %c0_1 = arith.constant 0 : index
    %0 = vector.load %arg1[%c0, %c0_0, %c0_1] : memref<1x64x4xf32, #tpu.memory_space<vmem>>, vector<1x64x4xf32>
    %1 = vector.shape_cast %0 : vector<1x64x4xf32> to vector<64x4xf32>
    %cst = arith.constant 0.000000e+00 : f32
    %2 = vector.broadcast %cst : f32 to vector<1x4xf32>
    %3 = vector.extract_strided_slice %1 {offsets = [0, 0], sizes = [63, 4], strides = [1, 1]} : vector<64x4xf32> to vector<63x4xf32>
    %4 = tpu.concatenate %2, %3 in 0 : vector<1x4xf32>, vector<63x4xf32> -> vector<64x4xf32>
    %5 = vector.extract_strided_slice %1 {offsets = [1, 0], sizes = [63, 4], strides = [1, 1]} : vector<64x4xf32> to vector<63x4xf32>
    %6 = tpu.concatenate %5, %2 in 0 : vector<63x4xf32>, vector<1x4xf32> -> vector<64x4xf32>
    %7 = tpu.concatenate %4, %1, %6 in 1 : vector<64x4xf32>, vector<64x4xf32>, vector<64x4xf32> -> vector<64x12xf32>
    %8 = arith.truncf %7 : vector<64x12xf32> to vector<64x12xbf16>
    %c0_2 = arith.constant 0 : index
    %c0_3 = arith.constant 0 : index
    %9 = vector.load %arg2[%c0_2, %c0_3] : memref<12x64xbf16, #tpu.memory_space<vmem>>, vector<12x64xbf16>
    %cst_4 = arith.constant dense<0.000000e+00> : vector<64x64xf32>
    %10 = tpu.matmul %8, %9, %cst_4 {dimension_numbers = #tpu.dot_dimension_numbers<[1], [0], [0], [1], [0, 0, 1, 1], [], []>} : vector<64x12xbf16>, vector<12x64xbf16>, vector<64x64xf32> -> vector<64x64xf32>
    %c0_5 = arith.constant 0 : index
    %c0_6 = arith.constant 0 : index
    %11 = vector.load %arg3[%c0_5, %c0_6] : memref<1x64xf32, #tpu.memory_space<vmem>>, vector<1x64xf32>
    %12 = vector.broadcast %11 : vector<1x64xf32> to vector<64x64xf32>
    %13 = arith.addf %10, %12 : vector<64x64xf32>
    %cst_7 = arith.constant 0.000000e+00 : f32
    %14 = vector.broadcast %cst_7 : f32 to vector<64x64xf32>
    %15 = arith.maximumf %13, %14 : vector<64x64xf32>
    %16 = vector.shape_cast %15 : vector<64x64xf32> to vector<32x2x64xf32>
    %cst_8 = arith.constant dense<0xFF800000> : vector<32x64xf32>
    %17 = vector.multi_reduction <maximumf>, %16, %cst_8 [1] : vector<32x2x64xf32> to vector<32x64xf32>
    %cst_9 = arith.constant 0.000000e+00 : f32
    %18 = vector.broadcast %cst_9 : f32 to vector<1x64xf32>
    %19 = vector.extract_strided_slice %17 {offsets = [0, 0], sizes = [31, 64], strides = [1, 1]} : vector<32x64xf32> to vector<31x64xf32>
    %20 = tpu.concatenate %18, %19 in 0 : vector<1x64xf32>, vector<31x64xf32> -> vector<32x64xf32>
    %21 = vector.extract_strided_slice %17 {offsets = [1, 0], sizes = [31, 64], strides = [1, 1]} : vector<32x64xf32> to vector<31x64xf32>
    %22 = tpu.concatenate %21, %18 in 0 : vector<31x64xf32>, vector<1x64xf32> -> vector<32x64xf32>
    %23 = tpu.concatenate %20, %17, %22 in 1 : vector<32x64xf32>, vector<32x64xf32>, vector<32x64xf32> -> vector<32x192xf32>
    %24 = arith.truncf %23 : vector<32x192xf32> to vector<32x192xbf16>
    %c0_10 = arith.constant 0 : index
    %c0_11 = arith.constant 0 : index
    %25 = vector.load %arg4[%c0_10, %c0_11] : memref<192x128xbf16, #tpu.memory_space<vmem>>, vector<192x128xbf16>
    %cst_12 = arith.constant dense<0.000000e+00> : vector<32x128xf32>
    %26 = tpu.matmul %24, %25, %cst_12 {dimension_numbers = #tpu.dot_dimension_numbers<[1], [0], [0], [1], [0, 0, 1, 1], [], []>} : vector<32x192xbf16>, vector<192x128xbf16>, vector<32x128xf32> -> vector<32x128xf32>
    %c0_13 = arith.constant 0 : index
    %c0_14 = arith.constant 0 : index
    %27 = vector.load %arg5[%c0_13, %c0_14] : memref<1x128xf32, #tpu.memory_space<vmem>>, vector<1x128xf32>
    %28 = vector.broadcast %27 : vector<1x128xf32> to vector<32x128xf32>
    %29 = arith.addf %26, %28 : vector<32x128xf32>
    %cst_15 = arith.constant 0.000000e+00 : f32
    %30 = vector.broadcast %cst_15 : f32 to vector<32x128xf32>
    %31 = arith.maximumf %29, %30 : vector<32x128xf32>
    %32 = vector.shape_cast %31 : vector<32x128xf32> to vector<16x2x128xf32>
    %cst_16 = arith.constant dense<0xFF800000> : vector<16x128xf32>
    %33 = vector.multi_reduction <maximumf>, %32, %cst_16 [1] : vector<16x2x128xf32> to vector<16x128xf32>
    %cst_17 = arith.constant 0.000000e+00 : f32
    %34 = vector.broadcast %cst_17 : f32 to vector<1x128xf32>
    %35 = vector.extract_strided_slice %33 {offsets = [0, 0], sizes = [15, 128], strides = [1, 1]} : vector<16x128xf32> to vector<15x128xf32>
    %36 = tpu.concatenate %34, %35 in 0 : vector<1x128xf32>, vector<15x128xf32> -> vector<16x128xf32>
    %37 = vector.extract_strided_slice %33 {offsets = [1, 0], sizes = [15, 128], strides = [1, 1]} : vector<16x128xf32> to vector<15x128xf32>
    %38 = tpu.concatenate %37, %34 in 0 : vector<15x128xf32>, vector<1x128xf32> -> vector<16x128xf32>
    %39 = tpu.concatenate %36, %33, %38 in 1 : vector<16x128xf32>, vector<16x128xf32>, vector<16x128xf32> -> vector<16x384xf32>
    %40 = arith.truncf %39 : vector<16x384xf32> to vector<16x384xbf16>
    %c0_18 = arith.constant 0 : index
    %c0_19 = arith.constant 0 : index
    %41 = vector.load %arg6[%c0_18, %c0_19] : memref<384x256xbf16, #tpu.memory_space<vmem>>, vector<384x256xbf16>
    %cst_20 = arith.constant dense<0.000000e+00> : vector<16x256xf32>
    %42 = tpu.matmul %40, %41, %cst_20 {dimension_numbers = #tpu.dot_dimension_numbers<[1], [0], [0], [1], [0, 0, 1, 1], [], []>} : vector<16x384xbf16>, vector<384x256xbf16>, vector<16x256xf32> -> vector<16x256xf32>
    %c0_21 = arith.constant 0 : index
    %c0_22 = arith.constant 0 : index
    %43 = vector.load %arg7[%c0_21, %c0_22] : memref<1x256xf32, #tpu.memory_space<vmem>>, vector<1x256xf32>
    %44 = vector.broadcast %43 : vector<1x256xf32> to vector<16x256xf32>
    %45 = arith.addf %42, %44 : vector<16x256xf32>
    %cst_23 = arith.constant 0.000000e+00 : f32
    %46 = vector.broadcast %cst_23 : f32 to vector<16x256xf32>
    %47 = arith.maximumf %45, %46 : vector<16x256xf32>
    %48 = vector.shape_cast %47 : vector<16x256xf32> to vector<8x2x256xf32>
    %cst_24 = arith.constant dense<0xFF800000> : vector<8x256xf32>
    %49 = vector.multi_reduction <maximumf>, %48, %cst_24 [1] : vector<8x2x256xf32> to vector<8x256xf32>
    %c0_25 = arith.constant 0 : index
    %c0_26 = arith.constant 0 : index
    %c0_27 = arith.constant 0 : index
    %50 = vector.load %arg8[%c0_25, %c0_26, %c0_27] : memref<1x8x256xf32, #tpu.memory_space<vmem>>, vector<1x8x256xf32>
    %51 = vector.shape_cast %50 : vector<1x8x256xf32> to vector<8x256xf32>
    %52 = vector.shape_cast %49 : vector<8x256xf32> to vector<1x8x256xf32>
    tpu.vector_store %arg8[%c0_25, %c0_26, %c0_27], %52 {strides = array<i32>} : memref<1x8x256xf32, #tpu.memory_space<vmem>>, vector<1x8x256xf32>,
    return
  }
  func.func @transform_0(%arg0: i32) -> (i32, i32, i32) {
    %c0_i32 = arith.constant 0 : i32
    %c0_i32_0 = arith.constant 0 : i32
    %c0_i32_1 = arith.constant 0 : i32
    return %arg0, %c0_i32, %c0_i32_0 : i32, i32, i32
  }
  func.func @transform_1(%arg0: i32) -> (i32, i32) {
    %c0_i32 = arith.constant 0 : i32
    %c0_i32_0 = arith.constant 0 : i32
    %c0_i32_1 = arith.constant 0 : i32
    return %c0_i32, %c0_i32_0 : i32, i32
  }
  func.func @transform_2(%arg0: i32) -> (i32, i32) {
    %c0_i32 = arith.constant 0 : i32
    %c0_i32_0 = arith.constant 0 : i32
    %c0_i32_1 = arith.constant 0 : i32
    return %c0_i32, %c0_i32_0 : i32, i32
  }
  func.func @transform_3(%arg0: i32) -> (i32, i32) {
    %c0_i32 = arith.constant 0 : i32
    %c0_i32_0 = arith.constant 0 : i32
    %c0_i32_1 = arith.constant 0 : i32
    return %c0_i32, %c0_i32_0 : i32, i32
  }
  func.func @transform_4(%arg0: i32) -> (i32, i32) {
    %c0_i32 = arith.constant 0 : i32
    %c0_i32_0 = arith.constant 0 : i32
    %c0_i32_1 = arith.constant 0 : i32
    return %c0_i32, %c0_i32_0 : i32, i32
  }
  func.func @transform_5(%arg0: i32) -> (i32, i32) {
    %c0_i32 = arith.constant 0 : i32
    %c0_i32_0 = arith.constant 0 : i32
    %c0_i32_1 = arith.constant 0 : i32
    return %c0_i32, %c0_i32_0 : i32, i32
  }
  func.func @transform_6(%arg0: i32) -> (i32, i32) {
    %c0_i32 = arith.constant 0 : i32
    %c0_i32_0 = arith.constant 0 : i32
    %c0_i32_1 = arith.constant 0 : i32
    return %c0_i32, %c0_i32_0 : i32, i32
  }
  func.func @transform_7(%arg0: i32) -> (i32, i32, i32) {
    %c0_i32 = arith.constant 0 : i32
    %c0_i32_0 = arith.constant 0 : i32
    %c0_i32_1 = arith.constant 0 : i32
    return %arg0, %c0_i32, %c0_i32_0 : i32, i32, i32
  }
}

module attributes {stable_mosaic.version = 11 : i64} {
  func.func @_fc_kernel(%arg0: i32, %arg1: memref<2x512xf32, #tpu.memory_space<vmem>>, %arg2: memref<512x256xbf16, #tpu.memory_space<vmem>>, %arg3: memref<1x256xf32, #tpu.memory_space<vmem>>, %arg4: memref<256x128xbf16, #tpu.memory_space<vmem>>, %arg5: memref<1x128xf32, #tpu.memory_space<vmem>>, %arg6: memref<2x128xf32, #tpu.memory_space<vmem>>, %arg7: memref<2x256xf32, #tpu.memory_space<vmem>>) attributes {dimension_semantics = [#tpu.dimension_semantics<arbitrary>], iteration_bounds = array<i64: 4>, scalar_prefetch = 0 : i64, scratch_operands = 1 : i64, tpu.core_type = #tpu.core_type<tc>, window_params = [{transform_indices = @transform_0, window_bounds = array<i64: 2, 512>}, {transform_indices = @transform_1, window_bounds = array<i64: 512, 256>}, {pipeline_mode = #tpu.pipeline_mode<synchronous>, transform_indices = @transform_2, window_bounds = array<i64: 1, 256>}, {pipeline_mode = #tpu.pipeline_mode<synchronous>, transform_indices = @transform_3, window_bounds = array<i64: 256, 128>}, {pipeline_mode = #tpu.pipeline_mode<synchronous>, transform_indices = @transform_4, window_bounds = array<i64: 1, 128>}, {pipeline_mode = #tpu.pipeline_mode<synchronous>, transform_indices = @transform_5, window_bounds = array<i64: 2, 128>}]} {
    %c0_i32 = arith.constant 0 : i32
    %0 = arith.cmpi eq, %arg0, %c0_i32 : i32
    %1 = arith.extui %0 : i1 to i32
    %c0_i32_0 = arith.constant 0 : i32
    %2 = arith.cmpi ne, %1, %c0_i32_0 : i32
    scf.if %2 {
      %cst_9 = arith.constant 0.000000e+00 : f32
      %13 = vector.broadcast %cst_9 : f32 to vector<2x256xf32>
      %c0_10 = arith.constant 0 : index
      %c0_11 = arith.constant 0 : index
      %14 = vector.load %arg7[%c0_10, %c0_11] : memref<2x256xf32, #tpu.memory_space<vmem>>, vector<2x256xf32>
      tpu.vector_store %arg7[%c0_10, %c0_11], %13 {strides = array<i32>} : memref<2x256xf32, #tpu.memory_space<vmem>>, vector<2x256xf32>,
    } else {
    }
    %c0 = arith.constant 0 : index
    %c0_1 = arith.constant 0 : index
    %3 = vector.load %arg7[%c0, %c0_1] : memref<2x256xf32, #tpu.memory_space<vmem>>, vector<2x256xf32>
    %c0_2 = arith.constant 0 : index
    %c0_3 = arith.constant 0 : index
    %4 = vector.load %arg1[%c0_2, %c0_3] : memref<2x512xf32, #tpu.memory_space<vmem>>, vector<2x512xf32>
    %5 = arith.truncf %4 : vector<2x512xf32> to vector<2x512xbf16>
    %c0_4 = arith.constant 0 : index
    %c0_5 = arith.constant 0 : index
    %6 = vector.load %arg2[%c0_4, %c0_5] : memref<512x256xbf16, #tpu.memory_space<vmem>>, vector<512x256xbf16>
    %cst = arith.constant dense<0.000000e+00> : vector<2x256xf32>
    %7 = tpu.matmul %5, %6, %cst {dimension_numbers = #tpu.dot_dimension_numbers<[1], [0], [0], [1], [0, 0, 1, 1], [], []>} : vector<2x512xbf16>, vector<512x256xbf16>, vector<2x256xf32> -> vector<2x256xf32>
    %8 = arith.addf %3, %7 : vector<2x256xf32>
    %c0_6 = arith.constant 0 : index
    %c0_7 = arith.constant 0 : index
    %9 = vector.load %arg7[%c0_6, %c0_7] : memref<2x256xf32, #tpu.memory_space<vmem>>, vector<2x256xf32>
    tpu.vector_store %arg7[%c0_6, %c0_7], %8 {strides = array<i32>} : memref<2x256xf32, #tpu.memory_space<vmem>>, vector<2x256xf32>,
    %c3_i32 = arith.constant 3 : i32
    %10 = arith.cmpi eq, %arg0, %c3_i32 : i32
    %11 = arith.extui %10 : i1 to i32
    %c0_i32_8 = arith.constant 0 : i32
    %12 = arith.cmpi ne, %11, %c0_i32_8 : i32
    scf.if %12 {
      %c0_9 = arith.constant 0 : index
      %c0_10 = arith.constant 0 : index
      %13 = vector.load %arg7[%c0_9, %c0_10] : memref<2x256xf32, #tpu.memory_space<vmem>>, vector<2x256xf32>
      %c0_11 = arith.constant 0 : index
      %c0_12 = arith.constant 0 : index
      %14 = vector.load %arg3[%c0_11, %c0_12] : memref<1x256xf32, #tpu.memory_space<vmem>>, vector<1x256xf32>
      %15 = vector.broadcast %14 : vector<1x256xf32> to vector<2x256xf32>
      %16 = arith.addf %13, %15 : vector<2x256xf32>
      %cst_13 = arith.constant 0.000000e+00 : f32
      %17 = vector.broadcast %cst_13 : f32 to vector<2x256xf32>
      %18 = arith.maximumf %16, %17 : vector<2x256xf32>
      %19 = arith.truncf %18 : vector<2x256xf32> to vector<2x256xbf16>
      %c0_14 = arith.constant 0 : index
      %c0_15 = arith.constant 0 : index
      %20 = vector.load %arg4[%c0_14, %c0_15] : memref<256x128xbf16, #tpu.memory_space<vmem>>, vector<256x128xbf16>
      %cst_16 = arith.constant dense<0.000000e+00> : vector<2x128xf32>
      %21 = tpu.matmul %19, %20, %cst_16 {dimension_numbers = #tpu.dot_dimension_numbers<[1], [0], [0], [1], [0, 0, 1, 1], [], []>} : vector<2x256xbf16>, vector<256x128xbf16>, vector<2x128xf32> -> vector<2x128xf32>
      %c0_17 = arith.constant 0 : index
      %c0_18 = arith.constant 0 : index
      %22 = vector.load %arg5[%c0_17, %c0_18] : memref<1x128xf32, #tpu.memory_space<vmem>>, vector<1x128xf32>
      %23 = vector.broadcast %22 : vector<1x128xf32> to vector<2x128xf32>
      %24 = arith.addf %21, %23 : vector<2x128xf32>
      %c0_19 = arith.constant 0 : index
      %c0_20 = arith.constant 0 : index
      %25 = vector.load %arg6[%c0_19, %c0_20] : memref<2x128xf32, #tpu.memory_space<vmem>>, vector<2x128xf32>
      tpu.vector_store %arg6[%c0_19, %c0_20], %24 {strides = array<i32>} : memref<2x128xf32, #tpu.memory_space<vmem>>, vector<2x128xf32>,
    } else {
    }
    return
  }
  func.func @transform_0(%arg0: i32) -> (i32, i32) {
    %c0_i32 = arith.constant 0 : i32
    %c0_i32_0 = arith.constant 0 : i32
    return %c0_i32, %arg0 : i32, i32
  }
  func.func @transform_1(%arg0: i32) -> (i32, i32) {
    %c0_i32 = arith.constant 0 : i32
    %c0_i32_0 = arith.constant 0 : i32
    return %arg0, %c0_i32 : i32, i32
  }
  func.func @transform_2(%arg0: i32) -> (i32, i32) {
    %c0_i32 = arith.constant 0 : i32
    %c0_i32_0 = arith.constant 0 : i32
    %c0_i32_1 = arith.constant 0 : i32
    return %c0_i32, %c0_i32_0 : i32, i32
  }
  func.func @transform_3(%arg0: i32) -> (i32, i32) {
    %c0_i32 = arith.constant 0 : i32
    %c0_i32_0 = arith.constant 0 : i32
    %c0_i32_1 = arith.constant 0 : i32
    return %c0_i32, %c0_i32_0 : i32, i32
  }
  func.func @transform_4(%arg0: i32) -> (i32, i32) {
    %c0_i32 = arith.constant 0 : i32
    %c0_i32_0 = arith.constant 0 : i32
    %c0_i32_1 = arith.constant 0 : i32
    return %c0_i32, %c0_i32_0 : i32, i32
  }
  func.func @transform_5(%arg0: i32) -> (i32, i32) {
    %c0_i32 = arith.constant 0 : i32
    %c0_i32_0 = arith.constant 0 : i32
    %c0_i32_1 = arith.constant 0 : i32
    return %c0_i32, %c0_i32_0 : i32, i32
  }
}

</mosaic_0001>

<bundles_post_ra>
// kernel: _lambda_.2
= control target key start
LH: loop header
LB: loop body
LE: loop exit
PB: predicated region body
PF: predicated region fallthrough
CT: control target
= control target key end

     0   :  { %12 = vsyncpa [#allocation3], 0  ;;  %s3624_s0 = inlined_call_operand.vmem [shape: f32[2,64,4], index: 0, kind: input, shape index: {}]   ;;  %s3625_s1 = inlined_call_operand.vmem [shape: bf16[12,64], index: 1, kind: input, shape index: {}]   ;;  %s3626_s2 = inlined_call_operand.hbm [shape: f32[1,64], index: 2, kind: input, shape index: {}]   ;;  %s3627_s3 = inlined_call_operand.vmem [shape: bf16[192,128], index: 3, kind: input, shape index: {}]   ;;  %s3628_s4 = inlined_call_operand.hbm [shape: f32[1,128], index: 4, kind: input, shape index: {}]   ;;  %s3629_s5 = inlined_call_operand.vmem [shape: bf16[384,256], index: 5, kind: input, shape index: {}]   ;;  %s3630_s6 = inlined_call_operand.hbm [shape: f32[1,256], index: 6, kind: input, shape index: {}]   ;;  %s3631_s7 = inlined_call_operand.vmem [shape: f32[2,8,256], index: 7, kind: output, shape index: {}]  }
   0x1   :  { %13 = vsyncpa [#allocation5], 0  ;;  %s2725_s24 = smov 0  }
   0x2 LB: > { %s2731_s25 = sadd.s32 4294967295, %s2674_s24   ;;  %p2279_p0 = scmp.ge.s32.totalorder %s2674_s24, 1  ;;  %s2674_s24 = sphi %s2725_s24, %s19_s24  }
   0x3   : > { %p202_p1 = scmp.lt.s32.totalorder %s2674_s24, 3  ;;  %p3632_p2 = scmp.eq.s32.totalorder %s2731_s25, 0 }
   0x4   : > { %s2676_s27 = smov [#allocation4]   ;;  %s2677_s29 = smov [#allocation2]  }
   0x5   : > { %p2736_p3 = pnand %p2279_p0, %p202_p1  ;;  %s232_s28 = sshll.u32 %s2676_s27, 4  ;;  %s233_s28 = int_to_ptr.vmem [resolvable:$true] %s232_s28 }
   0x6   : > { %s218_s30 = sshll.u32 %s2677_s29, 4  ;;  %s2678_s8 = smov [#allocation6]   ;;  %s2748_s30 = int_to_ptr.vmem [resolvable:$true] %s218_s30 }
   0x7   : > { %s3634_s26 = scalar_select %p2736_p3, 1, 0 }
   0x8   : > { %p2408_p4 = pneg %p2736_p3  ;;  %s246_s9 = sshll.u32 %s2678_s8, 4  ;;  %s2750_s9 = int_to_ptr.vmem [resolvable:$true] %s246_s9 }
   0x9   : > { %s2576_s13 = scalar_lea.hbm %s3628_s4, 16 }
   0xa   : > { %p2744_p5 = pnand %p3632_p2, %p2408_p4  ;;  %p2577_p6 = scmp.ne.s32.totalorder %s3628_s4, %s2576_s13 }
   0xb   : > { %p2583_p10 = scmp.lt.u32.totalorder %s2576_s13, %s3628_s4 }
   0xc   : > { %p2760_p7 = pneg %p2744_p5 }
   0xe   : > { %p2579_p8 = pnand %p2760_p7, %p2577_p6 }
  0x10   : > { %p2580_p9 = pneg %p2579_p8 }
  0x12   : > { %p2585_p11 = pnand %p2583_p10, %p2580_p9 }
  0x14   : > { %2588 = shalt.err (!%p2585_p11)
}
  0x15   : > { %s2589_s19 = scalar_lea.vmem %s233_s28, 16  ;;  %s2596_s20 = scalar_lea.vmem %s233_s28, 32 }
  0x16   : > { %p2590_p12 = scmp.ne.s32.totalorder %s233_s28, %s2589_s19  ;;  %p2597_p1 = scmp.lt.s32.totalorder %s233_s28, %s233_s28 }
  0x17   : > { %p2598_p4 = scmp.lt.s32.totalorder %s2596_s20, %s2589_s19 }
  0x18   : > { %p2592_p13 = pnand %p2590_p12, %p2760_p7 }
  0x19   : > { %p2599_p2 = por %p2598_p4, %p2597_p1 }
  0x1a   : > { %p2593_p0 = pneg %p2592_p13 }
  0x1c   : > { %p2600_p3 = pnand %p2599_p2, %p2593_p0 }
  0x1e   : > { %2603 = shalt.err (!%p2600_p3)
}
  0x1f   : > { %2414 = dma.hbm_to_vmem [thread:$0]  (!%p2744_p5), %s3628_s4, 16, %s233_s28, [#allocation5]  }
  0x20   : > { %s2604_s29 = scalar_lea.hbm %s3626_s2, 16 }
  0x21   : > { %p2605_p6 = scmp.ne.s32.totalorder %s3626_s2, %s2604_s29  ;;  %p2611_p2 = scmp.lt.u32.totalorder %s2604_s29, %s3626_s2 }
  0x23   : > { %p2607_p8 = pnand %p2605_p6, %p2760_p7 }
  0x25   : > { %p2608_p9 = pneg %p2607_p8 }
  0x27   : > { %p2613_p3 = pnand %p2611_p2, %p2608_p9 }
  0x29   : > { %2616 = shalt.err (!%p2613_p3)
}
  0x2a   : > { %s2617_s28 = scalar_lea.vmem %s2748_s30, 16  ;;  %s2624_s14 = scalar_lea.vmem %s2748_s30, 32 }
  0x2b   : > { %p2618_p10 = scmp.ne.s32.totalorder %s2748_s30, %s2617_s28  ;;  %p2625_p13 = scmp.lt.s32.totalorder %s2748_s30, %s2748_s30 }
  0x2c   : > { %p2626_p0 = scmp.lt.s32.totalorder %s2624_s14, %s2617_s28 }
  0x2d   : > { %p2620_p11 = pnand %p2618_p10, %p2760_p7 }
  0x2e   : > { %p2627_p1 = por %p2626_p0, %p2625_p13 }
  0x2f   : > { %p2621_p12 = pneg %p2620_p11 }
  0x31   : > { %p2628_p4 = pnand %p2627_p1, %p2621_p12 }
  0x33   : > { %2631 = shalt.err (!%p2628_p4)
}
  0x34   : > { %2411 = dma.hbm_to_vmem [thread:$0]  (!%p2744_p5), %s3626_s2, 16, %s2748_s30, [#allocation3]  }
  0x35   : > { %s2632_s20 = scalar_lea.hbm %s3630_s6, 32 }
  0x36   : > { %p2633_p6 = scmp.ne.s32.totalorder %s3630_s6, %s2632_s20  ;;  %p2639_p2 = scmp.lt.u32.totalorder %s2632_s20, %s3630_s6 }
  0x38   : > { %p2635_p8 = pnand %p2633_p6, %p2760_p7 }
  0x3a   : > { %p2636_p9 = pneg %p2635_p8 }
  0x3c   : > { %p2641_p3 = pnand %p2639_p2, %p2636_p9 }
  0x3e   : > { %2644 = shalt.err (!%p2641_p3)
}
  0x3f   : > { %s2645_s30 = scalar_lea.vmem %s2750_s9, 32  ;;  %p2653_p13 = scmp.lt.s32.totalorder %s2750_s9, %s2750_s9 }
  0x40   : > { %p2646_p10 = scmp.ne.s32.totalorder %s2750_s9, %s2645_s30  ;;  %p2654_p0 = scmp.lt.s32.totalorder %s2645_s30, %s2645_s30 }
  0x42   : > { %p2648_p11 = pnand %p2646_p10, %p2760_p7  ;;  %p2655_p1 = por %p2654_p0, %p2653_p13 }
  0x44   : > { %p2649_p12 = pneg %p2648_p11 }
  0x46   : > { %p2656_p4 = pnand %p2655_p1, %p2649_p12 }
  0x48   : > { %2659 = shalt.err (!%p2656_p4)
}
  0x49   : > { %2417 = dma.hbm_to_vmem [thread:$0]  (!%p2744_p5), %s3630_s6, 32, %s2750_s9, [#allocation5]  }
  0x4a   : > { %p3637_p6 = scmp.ne.s32.totalorder %s3634_s26, 0 }
  0x4b   : > { %p3638_p8 = scmp.eq.s32.totalorder (!%p3637_p6), %s2731_s25, 0 }
  0x4c   : > { %267 = sbr.rel (%p3637_p6) target bundleno = 1166 (0x48e), region = 48 }
  0x53   : > { %2665 = dma.done.wait (%p3638_p8), [#allocation3], 16   ;;  %p3639_p7 = pmov %p3638_p8 }
  0x55   : > { %2667 = vsyncadd (%p3639_p7), [#allocation3], 4294967280  ;;  %p3640_p9 = pmov %p3639_p7 }
  0x56   : > { %p3641_p2 = pmov %p3639_p7 }
  0x57   : > { %2669 = dma.done.wait (%p3640_p9), [#allocation5], 48  }
  0x58   : > { %2671 = vsyncadd (%p3641_p2), [#allocation5], 4294967248  ;;  %p307_p3 = scmp.lt.s32.totalorder %s2731_s25, 1  ;;  %vm359_vm0 = vcmask 1046528   ;;  %vm334_vm1 = vcmask 1040384   ;;  %vm475_vm2 = vcmask 1045504  }
  0x59   : > { %s2679_s11 = smov 4   ;;  %v2491_v23 = vld [vmem:[%s3625_s1] sm:$0x3f]   ;;  %s2680_s28 = smov 8   ;;  %vm426_vm3 = vcmask 31744   ;;  %vm435_vm4 = vcmask 64512  }
  0x5a   : > { %s3643_s25 = smov (!%p307_p3, %s2731_s25), 1  ;;  %2395 = vmatprep.subr.msk.bf16.mxu0 %vm475_vm2, %v2491_v23  ;;  %v477_v39 = vsel %vm475_vm2, %v2491_v23, 0  ;;  %vm462_vm5 = vcmask 97280   ;;  %vm728_vm6 = vcmask 517120   ;;  %vm996_vm7 = vcmask 1041409   ;;  %s2683_s18 = smov 64  }
  0x5b   : > { %s2370_s26 = sshll.u32 %s3643_s25, 6  ;;  %2378 = vmatpush3.bf16.msra.mxu0 %v477_v39  ;;  %v2682_v39 = vmov 1983009808   ;;  %vm984_vm8 = vcmask 1042434   ;;  %vm986_vm9 = vcmask 1043459   ;;  %vm988_vm10 = vcmask 1044484  }
  0x5c   : > { %s311_s16 = scalar_lea.vmem %s3624_s0, %s2370_s26  ;;  %vm990_vm11 = vcmask 1045509   ;;  %vm992_vm12 = vcmask 1046534   ;;  %vm994_vm13 = vcmask 1047559   ;;  %vm1096_vm14 = vcmask 523264  }
  0x5d   : > { %v2841_v0 = vld [vmem:[%s311_s16] sm:$0xff]  ;;  %v319_v1 = vld [vmem:[%s311_s16 + $0x8] sm:$0xff]  ;;  %v320_v2 = vld [vmem:[%s311_s16 + $0x10] sm:$0xff]  ;;  %vm1355_vm15 = vcmask 1041408   ;;  %vm2684_vm2 = vmmov 1  }
  0x5e   : > { %v336_v3 = vrot.slane %v319_v1, 7  ;;  %v361_v4 = vrot.slane %v319_v1, 1  ;;  %v2441_v5 = vpack.i.bf16 %v319_v1, %v2841_v0  ;;  %v335_v6 = vrot.slane %v2841_v0, 7  ;;  %v321_v7 = vld [vmem:[%s311_s16 + $0x18] sm:$0xff]  ;;  %v322_v8 = vld [vmem:[%s311_s16 + $0x20] sm:$0xff]  ;;  %v323_v9 = vld [vmem:[%s311_s16 + $0x28] sm:$0xff] }
  0x5f   : > { %v360_v10 = vrot.slane %v2841_v0, 1  ;;  %v338_v11 = vrot.slane %v320_v2, 7  ;;  %v363_v12 = vrot.slane %v320_v2, 1  ;;  %v340_v13 = vrot.slane %v321_v7, 7  ;;  %v324_v14 = vld [vmem:[%s311_s16 + $0x30] sm:$0xff]  ;;  %v325_v15 = vld [vmem:[%s311_s16 + $0x38] sm:$0xff] }
  0x60   : > { %2442 = vrot.lane.b32.xlu0 %v2441_v5, %s2679_s11  ;;  %v365_v16 = vrot.slane %v321_v7, 1  ;;  %v2446_v17 = vpack.i.bf16 %v321_v7, %v320_v2  ;;  %v367_v18 = vrot.slane %v322_v8, 1  ;;  %v344_v19 = vrot.slane %v323_v9, 7  ;;  %s2371_s16 = sshll.u32 %s3643_s25, 4 }
  0x61   : > { %v362_v20 = vsel %vm359_vm0, %v360_v10, %v361_v4  ;;  %v364_v21 = vsel %vm359_vm0, %v361_v4, %v363_v12  ;;  %v369_v22 = vrot.slane %v323_v9, 1  ;;  %v348_v27 = vrot.slane %v325_v15, 7  ;;  %s316_s13 = scalar_lea.vmem %s3631_s7, %s2371_s16 }
  0x62   : > { %v2456_v24 = vpack.i.bf16 %v364_v21, %v362_v20  ;;  %v366_v25 = vsel %vm359_vm0, %v363_v12, %v365_v16  ;;  %v368_v26 = vsel %vm359_vm0, %v365_v16, %v367_v18  ;;  %v2451_v28 = vpack.i.bf16 %v323_v9, %v322_v8 }
  0x63   : > { %v346_v29 = vrot.slane %v324_v14, 7  ;;  %v371_v30 = vrot.slane %v324_v14, 1  ;;  %v2461_v31 = vpack.i.bf16 %v368_v26, %v366_v25  ;;  %v373_v32 = vrot.slane %v325_v15, 1 }
  0x64   : > { %2457 = vrot.lane.b32.xlu1 %v2456_v24, %s2680_s28  ;;  %2447 = vrot.lane.b32.xlu0 %v2446_v17, %s2679_s11  ;;  %v339_v33 = vsel %vm334_vm1, %v336_v3, %v338_v11  ;;  %v341_v34 = vsel %vm334_vm1, %v338_v11, %v340_v13  ;;  %v370_v35 = vsel %vm359_vm0, %v367_v18, %v369_v22  ;;  %v342_v37 = vrot.slane %v322_v8, 7 }
  0x65   : > { %v372_v36 = vsel %vm359_vm0, %v369_v22, %v371_v30  ;;  %v337_v38 = vsel %vm334_vm1, %v335_v6, %v336_v3  ;;  %v347_v42 = vsel %vm334_vm1, %v344_v19, %v346_v29  ;;  %v2466_v43 = vpack.i.bf16 %v325_v15, %v324_v14 }
  0x66   : > { %v343_v40 = vsel %vm334_vm1, %v340_v13, %v342_v37  ;;  %v345_v41 = vsel %vm334_vm1, %v342_v37, %v344_v19  ;;  %v2471_v44 = vpack.i.bf16 %v372_v36, %v370_v35  ;;  %v376_v45 = vsel %vm359_vm0, %v373_v32, 0.0  ;;  %v2496_v35 = vld [vmem:[%s3627_s3 + $0x20] sm:$0xff]   ;;  %v2497_v36 = vld [vmem:[%s3627_s3 + $0x28] sm:$0xff]   ;;  %v2498_v37 = vld [vmem:[%s3627_s3 + $0x30] sm:$0xff]  }
  0x67   : > { %v349_v46 = vsel %vm334_vm1, %v346_v29, %v348_v27  ;;  %v374_v47 = vsel %vm359_vm0, %v371_v30, %v373_v32  ;;  %v358_v52 = vsel %vm334_vm1, 0.0, %v335_v6  ;;  %v2492_v30 = vld [vmem:[%s3627_s3] sm:$0xff]   ;;  %v2493_v32 = vld [vmem:[%s3627_s3 + $0x8] sm:$0xff]  }
  0x68   : > { %2462 = vrot.lane.b32.xlu1 %v2461_v31, %s2680_s28  ;;  %2452 = vrot.lane.b32.xlu0 %v2451_v28, %s2679_s11  ;;  %v2476_v48 = vpack.i.bf16 %v376_v45, %v374_v47  ;;  %v2681_v31 = vmov 0   ;;  %v2929_v45 = vld [vmem:[#allocation2] ss:$0 sm:$0xff] }
  0x69   : > { %1214 = vmatprep.subr.bf16.mxu1 %v2681_v31 }
  0x6a   : > { %1215 = vmatpush1.bf16.msra.mxu1 %v2492_v30 }
  0x6b   : > { %1216 = vmatprep.subr.bf16.mxu1 %v2681_v31 }
  0x6c   : > { %2467 = vrot.lane.b32.xlu1 %v2466_v43, %s2679_s11  ;;  %2472 = vrot.lane.b32.xlu0 %v2471_v44, %s2680_s28 }
  0x6e   : > { %1217 = vmatpush1.bf16.msra.mxu1 %v2493_v32 }
  0x6f   : > { %1218 = vmatprep.subr.bf16.mxu1 %v2681_v31 }
  0x70   : > { %2477 = vrot.lane.b32.xlu1 %v2476_v48, %s2680_s28 }
  0xd2   : > { %v2443_v49 = vpop.permute.xlu0 %2442 }
  0xd3   : > { %v2445_v50 = vunpack.i.h.bf16 %v2443_v49  ;;  %v2444_v51 = vunpack.i.l.bf16 %v2443_v49 }
  0xd5   : > { %v427_v55 = vsel %vm426_vm3, %v358_v52, %v2444_v51  ;;  %v428_v56 = vsel %vm426_vm3, %v337_v38, %v2445_v50  ;;  %v2499_v38 = vld [vmem:[%s3627_s3 + $0x38] sm:$0xff]  }
  0xd6   : > { %v2458_v53 = vpop.permute.xlu1 %2457  ;;  %v2448_v54 = vpop.permute.xlu0 %2447 }
  0xd7   : > { %v2460_v57 = vunpack.i.h.bf16 %v2458_v53  ;;  %v2459_v58 = vunpack.i.l.bf16 %v2458_v53  ;;  %v2450_v59 = vunpack.i.h.bf16 %v2448_v54  ;;  %v2449_v60 = vunpack.i.l.bf16 %v2448_v54  ;;  %v2502_v53 = vld [vmem:[%s3627_s3 + $0x50] sm:$0xff]  }
  0xd9   : > { %v436_v61 = vsel %vm435_vm4, %v427_v55, %v2459_v58  ;;  %v437_v62 = vsel %vm435_vm4, %v428_v56, %v2460_v57  ;;  %v430_v63 = vsel %vm426_vm3, %v341_v34, %v2450_v59  ;;  %v429_v0 = vsel %vm426_vm3, %v339_v33, %v2449_v60  ;;  %v2494_v33 = vld [vmem:[%s3627_s3 + $0x10] sm:$0xff]   ;;  %v2495_v34 = vld [vmem:[%s3627_s3 + $0x18] sm:$0xff]  }
  0xda   : > { %v2463_v1 = vpop.permute.xlu1 %2462  ;;  %v2453_v2 = vpop.permute.xlu0 %2452  ;;  %v444_v3 = vpack.c.bf16 %v437_v62, %v436_v61  ;;  %1219 = vmatpush1.bf16.msra.mxu1 %v2494_v33 }
  0xdb   : > { %v2465_v4 = vunpack.i.h.bf16 %v2463_v1  ;;  %v2464_v5 = vunpack.i.l.bf16 %v2463_v1  ;;  %v2455_v6 = vunpack.i.h.bf16 %v2453_v2  ;;  %v2454_v7 = vunpack.i.l.bf16 %v2453_v2  ;;  %1220 = vmatprep.subr.bf16.mxu1 %v2681_v31 }
  0xdc   : > { %2379 = vmatprep.mubr.msk.bf16.mxu0 %vm462_vm5, %v444_v3 }
  0xdd   : > { %v439_v8 = vsel %vm435_vm4, %v430_v63, %v2465_v4  ;;  %v438_v9 = vsel %vm435_vm4, %v429_v0, %v2464_v5  ;;  %v432_v11 = vsel %vm426_vm3, %v345_v41, %v2455_v6  ;;  %v431_v12 = vsel %vm426_vm3, %v343_v40, %v2454_v7 }
  0xde   : > { %v445_v10 = vpack.c.bf16 %v439_v8, %v438_v9  ;;  %v2468_v13 = vpop.permute.xlu1 %2467  ;;  %v2473_v14 = vpop.permute.xlu0 %2472  ;;  %1221 = vmatpush1.bf16.msra.mxu1 %v2495_v34  ;;  %v562_v40 = vunpack.c.l.s4 %v2682_v39  ;;  %v564_v41 = vlaneseq }
  0xdf   : > { %v2475_v15 = vunpack.i.h.bf16 %v2473_v14  ;;  %v2474_v16 = vunpack.i.l.bf16 %v2473_v14  ;;  %v2470_v17 = vunpack.i.h.bf16 %v2468_v13  ;;  %v2469_v18 = vunpack.i.l.bf16 %v2468_v13  ;;  %1222 = vmatprep.subr.bf16.mxu1 %v2681_v31 }
  0xe0   : > { %2380 = vmatmul.mubr.msk.bf16.vlgmr.msra.gmra.mrb[0].mxu0 %vm462_vm5, %v445_v10  ;;  %v563_v43 = vunpack.c.0.s8 %v562_v40  ;;  %v2927_v44 = vshrl.u32 %v564_v41, 7 }
  0xe1   : > { %v440_v19 = vsel %vm435_vm4, %v431_v12, %v2474_v16  ;;  %v441_v20 = vsel %vm435_vm4, %v432_v11, %v2475_v15  ;;  %v434_v25 = vsel %vm426_vm3, %v349_v46, %v2470_v17  ;;  %v433_v26 = vsel %vm426_vm3, %v347_v42, %v2469_v18  ;;  %v2500_v42 = vld [vmem:[%s3627_s3 + $0x40] sm:$0xff]   ;;  %v2501_v46 = vld [vmem:[%s3627_s3 + $0x48] sm:$0xff]   ;;  %vm2365_vm3 = vmpackc.low %vm359_vm0, %vm2684_vm2 }
  0xe2   : > { %v446_v21 = vpack.c.bf16 %v441_v20, %v440_v19  ;;  %v2478_v22 = vpop.permute.xlu1 %2477  ;;  %1223 = vmatpush1.bf16.msra.mxu1 %v2496_v35  ;;  %v2937_v49 = vsub.s32 %v563_v43, %v2927_v44 }
  0xe3   : > { %v2480_v23 = vunpack.i.h.bf16 %v2478_v22  ;;  %v2479_v24 = vunpack.i.l.bf16 %v2478_v22  ;;  %1224 = vmatprep.subr.bf16.mxu1 %v2681_v31 }
  0xe4   : > { %2383 = vmatprep.mubr.msk.bf16.mxu0 %vm462_vm5, %v446_v21 }
  0xe5   : > { %v442_v27 = vsel %vm435_vm4, %v433_v26, %v2479_v24  ;;  %v443_v28 = vsel %vm435_vm4, %v434_v25, %v2480_v23  ;;  %vm2361_vm4 = vmneg %vm334_vm1 }
  0xe6   : > { %v447_v29 = vpack.c.bf16 %v443_v28, %v442_v27  ;;  %1225 = vmatpush1.bf16.msra.mxu1 %v2497_v36 }
  0xe7   : > { %1226 = vmatprep.subr.bf16.mxu1 %v2681_v31 }
  0xe8   : > { %2384 = vmatmul.mubr.msk.bf16.gmra.mrb[4].mxu0 %vm462_vm5, %v447_v29 }
  0xea   : > { %1227 = vmatpush1.bf16.msra.mxu1 %v2498_v37 }
  0xeb   : > { %1228 = vmatprep.subr.bf16.mxu1 %v2681_v31 }
  0xee   : > { %1229 = vmatpush1.bf16.msra.mxu1 %v2499_v38 }
  0xef   : > { %1230 = vmatprep.subr.bf16.mxu1 %v2681_v31 }
  0xf2   : > { %1231 = vmatpush1.bf16.msra.mxu1 %v2500_v42 }
  0xf3   : > { %1232 = vmatprep.subr.bf16.mxu1 %v2681_v31 }
  0xf6   : > { %1233 = vmatpush1.bf16.msra.mxu1 %v2501_v46 }
  0xf7   : > { %1234 = vmatprep.subr.bf16.mxu1 %v2681_v31 }
  0xfa   : > { %1235 = vmatpush1.bf16.msra.mxu1 %v2502_v53 }
  0xfb   : > { %1236 = vmatprep.subr.bf16.mxu1 %v2681_v31 }
 0x1b3   : > { %v2381_v47 = vpop.f32.mrb[0].mxu0 }
 0x1b4   : > { %v522_v48 = vadd.f32 %v2381_v47, %v2929_v45  ;;  %v513_v50 = vpop.f32.mrb[1].mxu0 }
 0x1b5   : > { %v514_v51 = vadd.f32 %v2929_v45, %v513_v50  ;;  %v2382_v52 = vpop.f32.mrb[2].mxu0 }
 0x1b6   : > { %v546_v54 = vmax.f32 %v522_v48, 0.0  ;;  %v525_v55 = vadd.f32 %v2382_v52, %v2929_v45  ;;  %v516_v56 = vpop.f32.mrb[3].mxu0 }
 0x1b7   : > { %v544_v57 = vmax.f32 %v514_v51, 0.0  ;;  %v517_v58 = vadd.f32 %v2929_v45, %v516_v56 }
 0x1b8   : > { %v594_v59 = vcombine.high %v546_v54, %v546_v54  ;;  %v601_v60 = vrot.slane %v546_v54, %v2937_v49  ;;  %v2947_v61 = vmax.f32 %v525_v55, 0.0 }
 0x1b9   : > { %v560_v62 = vcombine.high %v544_v57, %v544_v57  ;;  %v567_v63 = vrot.slane %v544_v57, %v2937_v49  ;;  %v2950_v0 = vmax.f32 %v517_v58, 0.0 }
 0x1ba   : > { %v608_v1 = vrot.slane %v594_v59, %v2937_v49  ;;  %v609_v2 = vcombine.high %v601_v60, %v601_v60  ;;  %v785_v3 = vsel %vm728_vm6, %v601_v60, -inf  ;;  %v611_v4 = vcombine.high %v2947_v61, %v2947_v61 }
 0x1bb   : > { %v786_v5 = vrot.slane %v785_v3, 4  ;;  %v574_v6 = vrot.slane %v560_v62, %v2937_v49  ;;  %v575_v7 = vcombine.high %v567_v63, %v567_v63  ;;  %v729_v8 = vsel %vm728_vm6, %v567_v63, -inf  ;;  %v2959_v9 = vpop.f32.mrb[4].mxu0 }
 0x1bc   : > { %v610_v10 = vcombine.high %v608_v1, %v608_v1  ;;  %v792_v11 = vsel %vm728_vm6, %v609_v2, -inf  ;;  %v799_v12 = vsel %vm728_vm6, %v608_v1, -inf  ;;  %v730_v13 = vrot.slane %v729_v8, 4  ;;  %v2963_v14 = vpop.f32.mrb[5].mxu0 }
 0x1bd   : > { %v787_v15 = vmax.f32 %v785_v3, %v786_v5  ;;  %v793_v16 = vrot.slane %v792_v11, 4  ;;  %v800_v17 = vrot.slane %v799_v12, 4  ;;  %v576_v18 = vcombine.high %v574_v6, %v574_v6  ;;  %v2965_v19 = vpop.f32.mrb[6].mxu0 }
 0x1be   : > { %v806_v20 = vsel %vm728_vm6, %v610_v10, -inf  ;;  %v731_v21 = vmax.f32 %v729_v8, %v730_v13  ;;  %v736_v22 = vsel %vm728_vm6, %v575_v7, -inf  ;;  %v743_v23 = vsel %vm728_vm6, %v574_v6, -inf  ;;  %v2970_v24 = vpop.f32.mrb[7].mxu0 }
 0x1bf   : > { %v788_v25 = vrot.slane %v787_v15, 2  ;;  %v794_v26 = vmax.f32 %v792_v11, %v793_v16  ;;  %v801_v27 = vmax.f32 %v799_v12, %v800_v17  ;;  %v807_v28 = vrot.slane %v806_v20, 4 }
 0x1c0   : > { %v732_v29 = vrot.slane %v731_v21, 2  ;;  %v737_v30 = vrot.slane %v736_v22, 4  ;;  %v744_v32 = vrot.slane %v743_v23, 4  ;;  %v750_v33 = vsel %vm728_vm6, %v576_v18, -inf }
 0x1c1   : > { %v789_v34 = vmax.f32 %v787_v15, %v788_v25  ;;  %v795_v35 = vrot.slane %v794_v26, 2  ;;  %v802_v36 = vrot.slane %v801_v27, 2  ;;  %v808_v37 = vmax.f32 %v806_v20, %v807_v28 }
 0x1c2   : > { %v733_v38 = vmax.f32 %v731_v21, %v732_v29  ;;  %v738_v39 = vmax.f32 %v736_v22, %v737_v30  ;;  %v745_v40 = vmax.f32 %v743_v23, %v744_v32  ;;  %v751_v41 = vrot.slane %v750_v33, 4 }
 0x1c3   : > { %v790_v42 = vrot.slane %v789_v34, 1  ;;  %v796_v43 = vmax.f32 %v794_v26, %v795_v35  ;;  %v803_v46 = vmax.f32 %v801_v27, %v802_v36  ;;  %v809_v47 = vrot.slane %v808_v37, 2 }
 0x1c4   : > { %v734_v48 = vrot.slane %v733_v38, 1  ;;  %v739_v50 = vrot.slane %v738_v39, 2  ;;  %v746_v51 = vrot.slane %v745_v40, 2  ;;  %v752_v52 = vmax.f32 %v750_v33, %v751_v41 }
 0x1c5   : > { %v2973_v53 = vmax.f32 %v789_v34, %v790_v42  ;;  %v797_v54 = vrot.slane %v796_v43, 1  ;;  %v804_v55 = vrot.slane %v803_v46, 1  ;;  %v810_v56 = vmax.f32 %v808_v37, %v809_v47 }
 0x1c6   : > { %v735_v57 = vmax.f32 %v733_v38, %v734_v48  ;;  %v740_v58 = vmax.f32 %v738_v39, %v739_v50  ;;  %v747_v59 = vmax.f32 %v745_v40, %v746_v51  ;;  %v753_v60 = vrot.slane %v752_v52, 2 }
 0x1c7   : > { %v2975_v62 = vmax.f32 %v796_v43, %v797_v54  ;;  %v2977_v63 = vmax.f32 %v803_v46, %v804_v55  ;;  %v811_v1 = vrot.slane %v810_v56, 1  ;;  %v618_v2 = vrot.slane %v2947_v61, %v2937_v49 }
 0x1c8   : > { %v741_v3 = vrot.slane %v740_v58, 1  ;;  %v748_v5 = vrot.slane %v747_v59, 1  ;;  %v754_v6 = vmax.f32 %v752_v52, %v753_v60  ;;  %v625_v7 = vrot.slane %v611_v4, %v2937_v49 }
 0x1c9   : > { %v2985_v8 = vmax.f32 %v810_v56, %v811_v1  ;;  %v2990_v10 = vsel %vm996_vm7, %v2975_v62, %v2973_v53  ;;  %v626_v11 = vcombine.high %v618_v2, %v618_v2  ;;  %v813_v12 = vsel %vm728_vm6, %v618_v2, -inf }
 0x1ca   : > { %v2993_v13 = vmax.f32 %v740_v58, %v741_v3  ;;  %v2995_v15 = vmax.f32 %v747_v59, %v748_v5  ;;  %v755_v16 = vrot.slane %v754_v6, 1  ;;  %v627_v17 = vcombine.high %v625_v7, %v625_v7 }
 0x1cb   : > { %v814_v18 = vrot.slane %v813_v12, 4  ;;  %v820_v61 = vsel %vm728_vm6, %v626_v11, -inf  ;;  %v827_v4 = vsel %vm728_vm6, %v625_v7, -inf  ;;  %v577_v20 = vcombine.high %v2950_v0, %v2950_v0 }
 0x1cc   : > { %v3001_v21 = vmax.f32 %v754_v6, %v755_v16  ;;  %v985_v22 = vsel %vm984_vm8, %v2993_v13, %v735_v57  ;;  %v3007_v23 = vsel %vm996_vm7, %v2993_v13, %v735_v57  ;;  %v821_v25 = vrot.slane %v820_v61, 4 }
 0x1cd   : > { %v3011_v26 = vsel %vm986_vm9, %v2995_v15, %v985_v22  ;;  %v815_v27 = vmax.f32 %v813_v12, %v814_v18  ;;  %v828_v28 = vrot.slane %v827_v4, 4  ;;  %v834_v29 = vsel %vm728_vm6, %v627_v17, -inf }
 0x1ce   : > { %v822_v30 = vmax.f32 %v820_v61, %v821_v25  ;;  %v835_v32 = vrot.slane %v834_v29, 4  ;;  %v584_v33 = vrot.slane %v2950_v0, %v2937_v49  ;;  %v591_v34 = vrot.slane %v577_v20, %v2937_v49 }
 0x1cf   : > { %v816_v35 = vrot.slane %v815_v27, 2  ;;  %v829_v36 = vmax.f32 %v827_v4, %v828_v28  ;;  %v538_v37 = vadd.f32 %v2959_v9, %v2929_v45  ;;  %v530_v38 = vadd.f32 %v2929_v45, %v2963_v14 }
 0x1d0   : > { %v823_v39 = vrot.slane %v822_v30, 2  ;;  %v3021_v40 = vmax.f32 %v834_v29, %v835_v32  ;;  %v592_v41 = vcombine.high %v584_v33, %v584_v33  ;;  %v593_v42 = vcombine.high %v591_v34, %v591_v34 }
 0x1d1   : > { %v817_v43 = vmax.f32 %v815_v27, %v816_v35  ;;  %v830_v46 = vrot.slane %v829_v36, 2  ;;  %v757_v47 = vsel %vm728_vm6, %v584_v33, -inf  ;;  %v771_v0 = vsel %vm728_vm6, %v591_v34, -inf }
 0x1d2   : > { %v824_v48 = vmax.f32 %v822_v30, %v823_v39  ;;  %v837_v50 = vrot.slane %v3021_v40, 2  ;;  %v758_v51 = vrot.slane %v757_v47, 4  ;;  %v764_v9 = vsel %vm728_vm6, %v592_v41, -inf }
 0x1d3   : > { %v818_v52 = vrot.slane %v817_v43, 1  ;;  %v3027_v54 = vmax.f32 %v829_v36, %v830_v46  ;;  %v765_v14 = vrot.slane %v764_v9, 4  ;;  %v772_v55 = vrot.slane %v771_v0, 4 }
 0x1d4   : > { %v825_v56 = vrot.slane %v824_v48, 1  ;;  %v759_v57 = vmax.f32 %v757_v47, %v758_v51  ;;  %v778_v58 = vsel %vm728_vm6, %v593_v42, -inf  ;;  %v550_v59 = vmax.f32 %v538_v37, 0.0 }
 0x1d5   : > { %v3030_v60 = vmax.f32 %v817_v43, %v818_v52  ;;  %v832_v1 = vrot.slane %v3027_v54, 1  ;;  %v766_v2 = vmax.f32 %v764_v9, %v765_v14  ;;  %v773_v3 = vmax.f32 %v771_v0, %v772_v55 }
 0x1d6   : > { %v3033_v5 = vmax.f32 %v824_v48, %v825_v56  ;;  %v760_v6 = vrot.slane %v759_v57, 2  ;;  %v779_v7 = vrot.slane %v778_v58, 4  ;;  %v662_v11 = vcombine.high %v550_v59, %v550_v59 }
 0x1d7   : > { %v767_v12 = vrot.slane %v766_v2, 2  ;;  %v774_v16 = vrot.slane %v773_v3, 2  ;;  %v669_v17 = vrot.slane %v550_v59, %v2937_v49  ;;  %v548_v18 = vmax.f32 %v530_v38, 0.0 }
 0x1d8   : > { %v761_v61 = vmax.f32 %v759_v57, %v760_v6  ;;  %v3036_v4 = vmax.f32 %v778_v58, %v779_v7  ;;  %v676_v20 = vrot.slane %v662_v11, %v2937_v49  ;;  %v541_v22 = vadd.f32 %v2965_v19, %v2929_v45 }
 0x1d9   : > { %v768_v25 = vmax.f32 %v766_v2, %v767_v12  ;;  %v3041_v27 = vmax.f32 %v773_v3, %v774_v16  ;;  %v677_v28 = vcombine.high %v669_v17, %v669_v17  ;;  %v897_v29 = vsel %vm728_vm6, %v669_v17, -inf }
 0x1da   : > { %v762_v30 = vrot.slane %v761_v61, 1  ;;  %v781_v32 = vrot.slane %v3036_v4, 2  ;;  %v678_v33 = vcombine.high %v676_v20, %v676_v20  ;;  %v898_v34 = vrot.slane %v897_v29, 4 }
 0x1db   : > { %v769_v35 = vrot.slane %v768_v25, 1  ;;  %v776_v36 = vrot.slane %v3041_v27, 1  ;;  %v904_v37 = vsel %vm728_vm6, %v677_v28, -inf  ;;  %v911_v38 = vsel %vm728_vm6, %v676_v20, -inf }
 0x1dc   : > { %v3048_v39 = vmax.f32 %v761_v61, %v762_v30  ;;  %v899_v19 = vmax.f32 %v897_v29, %v898_v34  ;;  %v905_v41 = vrot.slane %v904_v37, 4  ;;  %v912_v42 = vrot.slane %v911_v38, 4 }
 0x1dd   : > { %v3050_v43 = vmax.f32 %v768_v25, %v769_v35  ;;  %v918_v46 = vsel %vm728_vm6, %v678_v33, -inf  ;;  %v628_v47 = vcombine.high %v548_v18, %v548_v18  ;;  %v635_v0 = vrot.slane %v548_v18, %v2937_v49 }
 0x1de   : > { %v900_v48 = vrot.slane %v899_v19, 2  ;;  %v906_v51 = vmax.f32 %v904_v37, %v905_v41  ;;  %v913_v9 = vmax.f32 %v911_v38, %v912_v42  ;;  %v919_v52 = vrot.slane %v918_v46, 4 }
 0x1df   : > { %v642_v14 = vrot.slane %v628_v47, %v2937_v49  ;;  %v643_v55 = vcombine.high %v635_v0, %v635_v0  ;;  %v841_v56 = vsel %vm728_vm6, %v635_v0, -inf  ;;  %v551_v57 = vmax.f32 %v541_v22, 0.0 }
 0x1e0   : > { %v901_v58 = vmax.f32 %v899_v19, %v900_v48  ;;  %v907_v59 = vrot.slane %v906_v51, 2  ;;  %v914_v2 = vrot.slane %v913_v9, 2  ;;  %v920_v3 = vmax.f32 %v918_v46, %v919_v52 }
 0x1e1   : > { %v644_v6 = vcombine.high %v642_v14, %v642_v14  ;;  %v842_v7 = vrot.slane %v841_v56, 4  ;;  %v848_v11 = vsel %vm728_vm6, %v643_v55, -inf  ;;  %v855_v12 = vsel %vm728_vm6, %v642_v14, -inf }
 0x1e2   : > { %v902_v16 = vrot.slane %v901_v58, 1  ;;  %v908_v17 = vmax.f32 %v906_v51, %v907_v59  ;;  %v915_v18 = vmax.f32 %v913_v9, %v914_v2  ;;  %v921_v61 = vrot.slane %v920_v3, 2 }
 0x1e3   : > { %v843_v20 = vmax.f32 %v841_v56, %v842_v7  ;;  %v849_v25 = vrot.slane %v848_v11, 4  ;;  %v856_v28 = vrot.slane %v855_v12, 4  ;;  %v862_v29 = vsel %vm728_vm6, %v644_v6, -inf }
 0x1e4   : > { %v3059_v22 = vmax.f32 %v901_v58, %v902_v16  ;;  %v909_v30 = vrot.slane %v908_v17, 1  ;;  %v916_v33 = vrot.slane %v915_v18, 1  ;;  %v922_v34 = vmax.f32 %v920_v3, %v921_v61 }
 0x1e5   : > { %v844_v35 = vrot.slane %v843_v20, 2  ;;  %v850_v37 = vmax.f32 %v848_v11, %v849_v25  ;;  %v857_v38 = vmax.f32 %v855_v12, %v856_v28  ;;  %v863_v19 = vrot.slane %v862_v29, 4 }
 0x1e6   : > { %v3061_v41 = vmax.f32 %v908_v17, %v909_v30  ;;  %v3063_v42 = vmax.f32 %v915_v18, %v916_v33  ;;  %v923_v46 = vrot.slane %v922_v34, 1  ;;  %v679_v47 = vcombine.high %v551_v57, %v551_v57 }
 0x1e7   : > { %v3065_v0 = vmax.f32 %v843_v20, %v844_v35  ;;  %v851_v48 = vrot.slane %v850_v37, 2  ;;  %v858_v51 = vrot.slane %v857_v38, 2  ;;  %v864_v9 = vmax.f32 %v862_v29, %v863_v19 }
 0x1e8   : > { %v3067_v52 = vmax.f32 %v922_v34, %v923_v46  ;;  %v1045_v14 = vsel %vm996_vm7, %v3063_v42, %v3061_v41  ;;  %v3075_v55 = vsel %vm996_vm7, %v3061_v41, %v3059_v22  ;;  %v686_v56 = vrot.slane %v551_v57, %v2937_v49 }
 0x1e9   : > { %v852_v58 = vmax.f32 %v850_v37, %v851_v48  ;;  %v859_v59 = vmax.f32 %v857_v38, %v858_v51  ;;  %v865_v2 = vrot.slane %v864_v9, 2  ;;  %v693_v3 = vrot.slane %v679_v47, %v2937_v49 }
 0x1ea   : > { %v694_v6 = vcombine.high %v686_v56, %v686_v56  ;;  %v925_v7 = vsel %vm728_vm6, %v686_v56, -inf  ;;  %v1046_v11 = vsel %vm984_vm8, %v3067_v52, %v1045_v14  ;;  %v533_v12 = vadd.f32 %v2929_v45, %v2970_v24 }
 0x1eb   : > { %v853_v16 = vrot.slane %v852_v58, 1  ;;  %v860_v17 = vrot.slane %v859_v59, 1  ;;  %v866_v18 = vmax.f32 %v864_v9, %v865_v2  ;;  %v695_v61 = vcombine.high %v693_v3, %v693_v3 }
 0x1ec   : > { %v926_v20 = vrot.slane %v925_v7, 4  ;;  %v932_v57 = vsel %vm728_vm6, %v694_v6, -inf  ;;  %v939_v25 = vsel %vm728_vm6, %v693_v3, -inf  ;;  %v549_v28 = vmax.f32 %v533_v12, 0.0 }
 0x1ed   : > { %v3086_v29 = vmax.f32 %v852_v58, %v853_v16  ;;  %v3088_v30 = vmax.f32 %v859_v59, %v860_v17  ;;  %v867_v33 = vrot.slane %v866_v18, 1  ;;  %v933_v34 = vrot.slane %v932_v57, 4 }
 0x1ee   : > { %v927_v35 = vmax.f32 %v925_v7, %v926_v20  ;;  %v940_v37 = vrot.slane %v939_v25, 4  ;;  %v946_v45 = vsel %vm728_vm6, %v695_v61, -inf  ;;  %v645_v24 = vcombine.high %v549_v28, %v549_v28 }
 0x1ef   : > { %v3091_v38 = vmax.f32 %v866_v18, %v867_v33  ;;  %v1038_v19 = vsel %vm996_vm7, %v3088_v30, %v3086_v29  ;;  %v934_v46 = vmax.f32 %v932_v57, %v933_v34  ;;  %v947_v47 = vrot.slane %v946_v45, 4 }
 0x1f0   : > { %v928_v48 = vrot.slane %v927_v35, 2  ;;  %v941_v51 = vmax.f32 %v939_v25, %v940_v37  ;;  %v652_v9 = vrot.slane %v549_v28, %v2937_v49  ;;  %v659_v14 = vrot.slane %v645_v24, %v2937_v49 }
 0x1f1   : > { %v935_v56 = vrot.slane %v934_v46, 2  ;;  %v3098_v58 = vmax.f32 %v946_v45, %v947_v47  ;;  %v3102_v59 = vsel %vm984_vm8, %v3091_v38, %v1038_v19  ;;  %v3107_v2 = vmax.f32 %v3041_v27, %v776_v36 }
 0x1f2   : > { %v929_v3 = vmax.f32 %v927_v35, %v928_v48  ;;  %v942_v6 = vrot.slane %v941_v51, 2  ;;  %v660_v7 = vcombine.high %v652_v9, %v652_v9  ;;  %v661_v12 = vcombine.high %v659_v14, %v659_v14 }
 0x1f3   : > { %v936_v16 = vmax.f32 %v934_v46, %v935_v56  ;;  %v949_v17 = vrot.slane %v3098_v58, 2  ;;  %v869_v18 = vsel %vm728_vm6, %v652_v9, -inf  ;;  %v883_v61 = vsel %vm728_vm6, %v659_v14, -inf }
 0x1f4   : > { %v930_v20 = vrot.slane %v929_v3, 1  ;;  %v3112_v57 = vmax.f32 %v941_v51, %v942_v6  ;;  %v870_v25 = vrot.slane %v869_v18, 4  ;;  %v876_v28 = vsel %vm728_vm6, %v660_v7, -inf  ;;  %v2503_v51 = vld [vmem:[%s3627_s3 + $0x58] sm:$0xff]  }
 0x1f5   : > { %v937_v27 = vrot.slane %v936_v16, 1  ;;  %v877_v36 = vrot.slane %v876_v28, 4  ;;  %v884_v33 = vrot.slane %v883_v61, 4  ;;  %v890_v34 = vsel %vm728_vm6, %v661_v12, -inf  ;;  %1237 = vmatpush1.bf16.msra.mxu1 %v2503_v51 }
 0x1f6   : > { %v3116_v35 = vmax.f32 %v929_v3, %v930_v20  ;;  %v944_v37 = vrot.slane %v3112_v57, 1  ;;  %v871_v45 = vmax.f32 %v869_v18, %v870_v25  ;;  %v891_v24 = vrot.slane %v890_v34, 4 }
 0x1f7   : > { %v3119_v19 = vmax.f32 %v936_v16, %v937_v27  ;;  %v878_v46 = vmax.f32 %v876_v28, %v877_v36  ;;  %v885_v47 = vmax.f32 %v883_v61, %v884_v33  ;;  %v782_v48 = vmax.f32 %v3036_v4, %v781_v32 }
 0x1f8   : > { %v3129_v9 = vsel %vm986_vm9, %v3116_v35, %v1046_v11  ;;  %v872_v14 = vrot.slane %v871_v45, 2  ;;  %v892_v56 = vmax.f32 %v890_v34, %v891_v24  ;;  %v3134_v3 = vmax.f32 %v3027_v54, %v832_v1 }
 0x1f9   : > { %v879_v6 = vrot.slane %v878_v46, 2  ;;  %v886_v7 = vrot.slane %v885_v47, 2  ;;  %v783_v12 = vrot.slane %v782_v48, 1  ;;  %v838_v4 = vmax.f32 %v3021_v40, %v837_v50 }
 0x1fa   : > { %v873_v32 = vmax.f32 %v871_v45, %v872_v14  ;;  %v893_v16 = vrot.slane %v892_v56, 2  ;;  %v1057_v11 = vsel %vm984_vm8, %v2995_v15, %v3007_v23  ;;  %v1064_v18 = vsel %vm984_vm8, %v2977_v63, %v2990_v10 }
 0x1fb   : > { %v880_v54 = vmax.f32 %v878_v46, %v879_v6  ;;  %v887_v1 = vmax.f32 %v885_v47, %v886_v7  ;;  %v784_v61 = vmax.f32 %v782_v48, %v783_v12  ;;  %v839_v20 = vrot.slane %v838_v4, 1 }
 0x1fc   : > { %v874_v25 = vrot.slane %v873_v32, 1  ;;  %v1058_v28 = vsel %vm986_vm9, %v3001_v21, %v1057_v11  ;;  %v1065_v40 = vsel %vm986_vm9, %v2985_v8, %v1064_v18  ;;  %v846_v50 = vrot.slane %v3065_v0, 1 }
 0x1fd   : > { %v881_v27 = vrot.slane %v880_v54, 1  ;;  %v888_v36 = vrot.slane %v887_v1, 1  ;;  %v840_v23 = vmax.f32 %v838_v4, %v839_v20  ;;  %v997_v33 = vsel %vm996_vm7, %v2973_v53, %v784_v61 }
 0x1fe   : > { %v3152_v10 = vmax.f32 %v873_v32, %v874_v25  ;;  %v998_v34 = vsel %vm984_vm8, %v2975_v62, %v997_v33  ;;  %v1059_v45 = vsel %vm988_vm10, %v3048_v39, %v1058_v28  ;;  %v1066_v24 = vsel %vm988_vm10, %v3030_v60, %v1065_v40 }
 0x1ff   : > { %v3160_v46 = vmax.f32 %v880_v54, %v881_v27  ;;  %v1060_v47 = vsel %vm990_vm11, %v3050_v43, %v1059_v45  ;;  %v1067_v48 = vsel %vm990_vm11, %v3033_v5, %v1066_v24  ;;  %v847_v51 = vmax.f32 %v3065_v0, %v846_v50 }
 0x200   : > { %v3170_v14 = vsel %vm986_vm9, %v3152_v10, %v3102_v59  ;;  %v1061_v6 = vsel %vm992_vm12, %v3107_v2, %v1060_v47  ;;  %v1068_v7 = vsel %vm992_vm12, %v3134_v3, %v1067_v48  ;;  %v1024_v12 = vsel %vm996_vm7, %v2995_v15, %v2993_v13 }
 0x201   : > { %v1062_v4 = vsel %vm994_vm13, %v784_v61, %v1061_v6  ;;  %v1069_v0 = vsel %vm994_vm13, %v840_v23, %v1068_v7  ;;  %v1004_v32 = vsel %vm996_vm7, %v847_v51, %v840_v23  ;;  %v1025_v59 = vsel %vm984_vm8, %v3001_v21, %v1024_v12 }
 0x202   : > { %v2481_v11 = vpack.i.bf16 %v1069_v0, %v1062_v4  ;;  %v1005_v18 = vsel %vm984_vm8, %v3086_v29, %v1004_v32  ;;  %v1026_v54 = vsel %vm986_vm9, %v3048_v39, %v1025_v59  ;;  %v1031_v13 = vsel %vm996_vm7, %v2977_v63, %v2975_v62 }
 0x203   : > { %v3193_v15 = vsel %vm986_vm9, %v3088_v30, %v1005_v18  ;;  %v1027_v20 = vsel %vm988_vm10, %v3050_v43, %v1026_v54  ;;  %v1032_v25 = vsel %vm984_vm8, %v2985_v8, %v1031_v13  ;;  %v1070_v28 = vsel %vm996_vm7, %v3086_v29, %v847_v51 }
 0x204   : > { %2482 = vrot.lane.b32.xlu0 %v2481_v11, %s2683_s18  ;;  %v1028_v40 = vsel %vm990_vm11, %v3107_v2, %v1027_v20  ;;  %v1033_v62 = vsel %vm986_vm9, %v3030_v60, %v1032_v25  ;;  %v1071_v50 = vsel %vm984_vm8, %v3088_v30, %v1070_v28  ;;  %v3208_v27 = vmax.f32 %v887_v1, %v888_v36  ;;  %v2507_v11 = vld [vmem:[%s3629_s5 + $0x10] ss:$8 sps:$4 sm:$0xff]   ;;  %v2512_v25 = vld [vmem:[%s3629_s5 + $0x24] ss:$8 sps:$4 sm:$0xff]  }
 0x205   : > { %v1029_v33 = vsel %vm992_vm12, %v784_v61, %v1028_v40  ;;  %v1034_v45 = vsel %vm988_vm10, %v3033_v5, %v1033_v62  ;;  %v894_v29 = vmax.f32 %v892_v56, %v893_v16  ;;  %v3216_v24 = vmax.f32 %v3112_v57, %v944_v37  ;;  %v2504_v37 = vld [vmem:[%s3629_s5] ss:$8 sps:$4 sm:$0xff]  }
 0x206   : > { %v1030_v47 = vsel %vm994_vm13, %v2973_v53, %v1029_v33  ;;  %v1035_v48 = vsel %vm990_vm11, %v3134_v3, %v1034_v45  ;;  %v950_v30 = vmax.f32 %v3098_v58, %v949_v17  ;;  %v1072_v1 = vsel %vm986_vm9, %v3091_v38, %v1071_v50  ;;  %v2506_v58 = vld [vmem:[%s3629_s5 + $0x4] ss:$8 sps:$4 sm:$0xff]  }
 0x207   : > { %v1036_v56 = vsel %vm992_vm12, %v840_v23, %v1035_v48  ;;  %v895_v16 = vrot.slane %v894_v29, 1  ;;  %v1073_v57 = vsel %vm988_vm10, %v3152_v10, %v1072_v1  ;;  %v1078_v53 = vsel %vm984_vm8, %v3063_v42, %v3075_v55  ;;  %v2509_v55 = vld [vmem:[%s3629_s5 + $0x14] ss:$8 sps:$4 sm:$0xff]   ;;  %1835 = vmatprep.subr.bf16.mxu0 %v2506_v58 }
 0x208   : > { %v1037_v17 = vsel %vm994_vm13, %v847_v51, %v1036_v56  ;;  %v951_v61 = vrot.slane %v950_v30, 1  ;;  %v1074_v36 = vsel %vm990_vm11, %v3160_v46, %v1073_v57  ;;  %v1079_v23 = vsel %vm986_vm9, %v3067_v52, %v1078_v53  ;;  %1836 = vmatpush1.bf16.msra.mxu0 %v2504_v37 }
 0x209   : > { %v1102_v6 = vpack.c.bf16 %v1037_v17, %v1030_v47  ;;  %v896_v7 = vmax.f32 %v894_v29, %v895_v16  ;;  %v1075_v12 = vsel %vm992_vm12, %v3208_v27, %v1074_v36  ;;  %v1080_v4 = vsel %vm988_vm10, %v3116_v35, %v1079_v23  ;;  %1837 = vmatprep.subr.bf16.mxu0 %v2509_v55 }
 0x20a   : > { %v952_v51 = vmax.f32 %v950_v30, %v951_v61  ;;  %v1081_v0 = vsel %vm990_vm11, %v3119_v19, %v1080_v4  ;;  %v989_v32 = vsel %vm988_vm10, %v3001_v21, %v3011_v26  ;;  %v999_v59 = vsel %vm986_vm9, %v2977_v63, %v998_v34  ;;  %v2525_v4 = vld [vmem:[%s3629_s5 + $0x70] ss:$8 sps:$4 sm:$0xff]  }
 0x20b   : > { %2311 = vmatprep.mubr.msk.bf16.mxu1 %vm1096_vm14, %v1102_v6  ;;  %v1011_v18 = vsel %vm996_vm7, %v3059_v22, %v896_v7  ;;  %v1076_v54 = vsel %vm994_vm13, %v896_v7, %v1075_v12  ;;  %v1082_v13 = vsel %vm992_vm12, %v3216_v24, %v1081_v0  ;;  %v991_v21 = vsel %vm990_vm11, %v3048_v39, %v989_v32  ;;  %v2524_v6 = vld [vmem:[%s3629_s5 + $0x64] ss:$8 sps:$4 sm:$0xff]   ;;  %v2527_v12 = vld [vmem:[%s3629_s5 + $0x74] ss:$8 sps:$4 sm:$0xff]   ;;  %v2531_v32 = vld [vmem:[%s3629_s5 + $0x80] ss:$8 sps:$4 sm:$0xff]  }
 0x20c   : > { %v1012_v63 = vsel %vm984_vm8, %v3061_v41, %v1011_v18  ;;  %v1083_v26 = vsel %vm994_vm13, %v952_v51, %v1082_v13  ;;  %v993_v34 = vsel %vm992_vm12, %v3050_v43, %v991_v21  ;;  %v1000_v20 = vsel %vm988_vm10, %v2985_v8, %v999_v59  ;;  %1838 = vmatpush1.bf16.msra.mxu0 %v2507_v11  ;;  %v2533_v0 = vld [vmem:[%s3629_s5 + $0x84] ss:$8 sps:$4 sm:$0xff]   ;;  %v2536_v59 = vld [vmem:[%s3629_s5 + $0x114] ss:$8 sps:$4 sm:$0xff]   ;;  %v2534_v11 = vld [vmem:[%s3629_s5 + $0x110] ss:$8 sps:$4 sm:$0xff]  }
 0x20d   : > { %v2486_v28 = vpack.i.bf16 %v1083_v26, %v1076_v54  ;;  %v995_v39 = vsel %vm994_vm13, %v3107_v2, %v993_v34  ;;  %v1001_v41 = vsel %vm990_vm11, %v3030_v60, %v1000_v20  ;;  %v1041_v40 = vsel %vm988_vm10, %v3160_v46, %v3170_v14  ;;  %v2510_v2 = vld [vmem:[%s3629_s5 + $0x20] ss:$8 sps:$4 sm:$0xff]   ;;  %1839 = vmatprep.subr.bf16.mxu0 %v2512_v25  ;;  %v2539_v18 = vld [vmem:[%s3629_s5 + $0x94] ss:$8 sps:$4 sm:$0xff]   ;;  %v2537_v54 = vld [vmem:[%s3629_s5 + $0x90] ss:$8 sps:$4 sm:$0xff]  }
 0x20e   : > { %v1002_v43 = vsel %vm992_vm12, %v3033_v5, %v1001_v41  ;;  %v1042_v8 = vsel %vm990_vm11, %v3208_v27, %v1041_v40  ;;  %v1048_v62 = vsel %vm988_vm10, %v3119_v19, %v3129_v9  ;;  %v1007_v50 = vsel %vm988_vm10, %v3091_v38, %v3193_v15  ;;  %v2515_v9 = vld [vmem:[%s3629_s5 + $0x34] ss:$8 sps:$4 sm:$0xff]   ;;  %v2542_v13 = vld [vmem:[%s3629_s5 + $0x124] ss:$8 sps:$4 sm:$0xff]   ;;  %v2540_v21 = vld [vmem:[%s3629_s5 + $0x120] ss:$8 sps:$4 sm:$0xff]  }
 0x20f   : > { %2487 = vrot.lane.b32.xlu1 %v2486_v28, %s2683_s18  ;;  %v1003_v60 = vsel %vm994_vm13, %v3134_v3, %v1002_v43  ;;  %v1043_v14 = vsel %vm992_vm12, %v896_v7, %v1042_v8  ;;  %v1049_v5 = vsel %vm990_vm11, %v3216_v24, %v1048_v62  ;;  %v1008_v3 = vsel %vm990_vm11, %v3152_v10, %v1007_v50  ;;  %v2522_v7 = vld [vmem:[%s3629_s5 + $0x60] ss:$8 sps:$4 sm:$0xff]   ;;  %v2548_v34 = vld [vmem:[%s3629_s5 + $0x134] ss:$8 sps:$4 sm:$0xff]   ;;  %v2546_v20 = vld [vmem:[%s3629_s5 + $0x130] ss:$8 sps:$4 sm:$0xff]  }
 0x210   : > { %v1044_v33 = vsel %vm994_vm13, %v3059_v22, %v1043_v14  ;;  %v1050_v45 = vsel %vm992_vm12, %v952_v51, %v1049_v5  ;;  %v1013_v29 = vsel %vm986_vm9, %v3063_v42, %v1012_v63  ;;  %v1009_v38 = vsel %vm992_vm12, %v3160_v46, %v1008_v3  ;;  %1840 = vmatpush1.bf16.msra.mxu0 %v2510_v2  ;;  %v2513_v42 = vld [vmem:[%s3629_s5 + $0x30] ss:$8 sps:$4 sm:$0xff]   ;;  %v2528_v51 = vld [vmem:[%s3629_s5 + $0x100] ss:$8 sps:$4 sm:$0xff]   ;;  %v2545_v63 = vld [vmem:[%s3629_s5 + $0xa4] ss:$8 sps:$4 sm:$0xff]  }
 0x211   : > { %v1055_v47 = vsel %vm359_vm0, %v1050_v45, 0.0  ;;  %v1014_v15 = vsel %vm988_vm10, %v3067_v52, %v1013_v29  ;;  %v1010_v22 = vsel %vm994_vm13, %v3208_v27, %v1009_v38  ;;  %1841 = vmatprep.subr.bf16.mxu0 %v2515_v9  ;;  %v2518_v52 = vld [vmem:[%s3629_s5 + $0x44] ss:$8 sps:$4 sm:$0xff]   ;;  %v2521_v27 = vld [vmem:[%s3629_s5 + $0x54] ss:$8 sps:$4 sm:$0xff]   ;;  %v1022_v16 = vsel %vm334_vm1, 0.0, %v995_v39  ;;  %vm2362_vm0 = vmpackc.low %vm2684_vm2, %vm2361_vm4 }
 0x212   : > { %v1104_v48 = vpack.c.bf16 %v1055_v47, %v1044_v33  ;;  %v1015_v30 = vsel %vm990_vm11, %v3116_v35, %v1014_v15  ;;  %v2516_v35 = vld [vmem:[%s3629_s5 + $0x40] ss:$8 sps:$4 sm:$0xff]   ;;  %v2551_v25 = vld [vmem:[%s3629_s5 + $0xb4] ss:$8 sps:$4 sm:$0xff]   ;;  %v2549_v28 = vld [vmem:[%s3629_s5 + $0xb0] ss:$8 sps:$4 sm:$0xff]  }
 0x213   : > { %v1016_v10 = vsel %vm992_vm12, %v3119_v19, %v1015_v30  ;;  %v2519_v19 = vld [vmem:[%s3629_s5 + $0x50] ss:$8 sps:$4 sm:$0xff]   ;;  %v2543_v26 = vld [vmem:[%s3629_s5 + $0xa0] ss:$8 sps:$4 sm:$0xff]   ;;  %v2554_v39 = vld [vmem:[%s3629_s5 + $0x144] ss:$8 sps:$4 sm:$0xff]  }
 0x214   : > { %v1017_v46 = vsel %vm994_vm13, %v3216_v24, %v1016_v10  ;;  %1842 = vmatpush1.bf16.msra.mxu0 %v2513_v42  ;;  %v2552_v41 = vld [vmem:[%s3629_s5 + $0x140] ss:$8 sps:$4 sm:$0xff]   ;;  %v2557_v40 = vld [vmem:[%s3629_s5 + $0xc4] ss:$8 sps:$4 sm:$0xff]   ;;  %v2560_v8 = vld [vmem:[%s3629_s5 + $0x154] ss:$8 sps:$4 sm:$0xff]  }
 0x215   : > { %1843 = vmatprep.subr.bf16.mxu0 %v2518_v52  ;;  %v2555_v43 = vld [vmem:[%s3629_s5 + $0xc0] ss:$8 sps:$4 sm:$0xff]   ;;  %v2558_v62 = vld [vmem:[%s3629_s5 + $0x150] ss:$8 sps:$4 sm:$0xff]   ;;  %v2563_v2 = vld [vmem:[%s3629_s5 + $0xd4] ss:$8 sps:$4 sm:$0xff]  }
 0x216   : > { %v2566_v14 = vld [vmem:[%s3629_s5 + $0x164] ss:$8 sps:$4 sm:$0xff]   ;;  %v2564_v5 = vld [vmem:[%s3629_s5 + $0x160] ss:$8 sps:$4 sm:$0xff]   ;;  %v2572_v33 = vld [vmem:[%s3629_s5 + $0x174] ss:$8 sps:$4 sm:$0xff]  }
 0x217   : > { %v2569_v50 = vld [vmem:[%s3629_s5 + $0xe4] ss:$8 sps:$4 sm:$0xff]   ;;  %v2567_v9 = vld [vmem:[%s3629_s5 + $0xe0] ss:$8 sps:$4 sm:$0xff]   ;;  %v2570_v45 = vld [vmem:[%s3629_s5 + $0x170] ss:$8 sps:$4 sm:$0xff]  }
 0x218   : > { %1844 = vmatpush1.bf16.msra.mxu0 %v2516_v35  ;;  %v2575_v3 = vld [vmem:[%s3629_s5 + $0xf4] ss:$8 sps:$4 sm:$0xff]   ;;  %v2573_v29 = vld [vmem:[%s3629_s5 + $0xf0] ss:$8 sps:$4 sm:$0xff]   ;;  %v3458_v47 = vld [vmem:[#allocation4] ss:$0 sm:$0xff] }
 0x219   : > { %1845 = vmatprep.subr.bf16.mxu0 %v2521_v27 }
 0x21c   : > { %1846 = vmatpush1.bf16.msra.mxu0 %v2519_v19 }
 0x21d   : > { %1847 = vmatprep.subr.bf16.mxu0 %v2524_v6 }
 0x220   : > { %1848 = vmatpush1.bf16.msra.mxu0 %v2522_v7 }
 0x221   : > { %1849 = vmatprep.subr.bf16.mxu0 %v2527_v12 }
 0x224   : > { %1850 = vmatpush1.bf16.msra.mxu0 %v2525_v4 }
 0x225   : > { %1851 = vmatprep.subr.bf16.mxu0 %v2533_v0 }
 0x228   : > { %1852 = vmatpush1.bf16.msra.mxu0 %v2531_v32 }
 0x229   : > { %1853 = vmatprep.subr.bf16.mxu0 %v2539_v18 }
 0x22c   : > { %1854 = vmatpush1.bf16.msra.mxu0 %v2537_v54 }
 0x22d   : > { %1855 = vmatprep.subr.bf16.mxu0 %v2545_v63 }
 0x230   : > { %1856 = vmatpush1.bf16.msra.mxu0 %v2543_v26 }
 0x231   : > { %1857 = vmatprep.subr.bf16.mxu0 %v2551_v25 }
 0x234   : > { %1858 = vmatpush1.bf16.msra.mxu0 %v2549_v28 }
 0x235   : > { %1859 = vmatprep.subr.bf16.mxu0 %v2557_v40 }
 0x238   : > { %1860 = vmatpush1.bf16.msra.mxu0 %v2555_v43 }
 0x239   : > { %1861 = vmatprep.subr.bf16.mxu0 %v2563_v2 }
 0x276   : > { %v2483_v1 = vpop.permute.xlu0 %2482 }
 0x277   : > { %v2485_v56 = vunpack.i.h.bf16 %v2483_v1  ;;  %v2484_v24 = vunpack.i.l.bf16 %v2483_v1 }
 0x279   : > { %v1097_v57 = vsel %vm1096_vm14, %v1022_v16, %v2484_v24  ;;  %v1098_v53 = vsel %vm1096_vm14, %v1003_v60, %v2485_v56  ;;  %v2561_v60 = vld [vmem:[%s3629_s5 + $0xd0] ss:$8 sps:$4 sm:$0xff]  }
 0x27a   : > { %v1101_v37 = vpack.c.bf16 %v1098_v53, %v1097_v57  ;;  %1862 = vmatpush1.bf16.msra.mxu0 %v2561_v60 }
 0x27b   : > { %1863 = vmatprep.subr.bf16.mxu0 %v2569_v50 }
 0x27c   : > { %1247 = vmatmul.mubr.bf16.vlgmr.msra.gmra.mrb[0].mxu1 %v1101_v37 }
 0x27d   : > { %2312 = vmatprep.mubr.msk.bf16.mxu1 %vm1096_vm14, %v1104_v48 }
 0x27e   : > { %1864 = vmatpush1.bf16.msra.mxu0 %v2567_v9 }
 0x27f   : > { %1865 = vmatprep.subr.bf16.mxu0 %v2575_v3 }
 0x281   : > { %v2488_v58 = vpop.permute.xlu1 %2487 }
 0x282   : > { %v2490_v17 = vunpack.i.h.bf16 %v2488_v58  ;;  %v2489_v61 = vunpack.i.l.bf16 %v2488_v58  ;;  %1866 = vmatpush1.bf16.msra.mxu0 %v2573_v29 }
 0x284   : > { %v1099_v36 = vsel %vm1096_vm14, %v1010_v22, %v2489_v61  ;;  %v1100_v23 = vsel %vm1096_vm14, %v1017_v46, %v2490_v17 }
 0x285   : > { %v1103_v55 = vpack.c.bf16 %v1100_v23, %v1099_v36 }
 0x287   : > { %1255 = vmatmul.mubr.bf16.gmra.mrb[4].mxu1 %v1103_v55 }
 0x288   : > { %1910 = vmatprep.mubr.bf16.mxu1 %v2681_v31  ;;  %v2530_v31 = vld [vmem:[%s3629_s5 + $0x104] ss:$8 sps:$4 sm:$0xff]  }
 0x289   : > { %1878 = vmatprep.subr.bf16.mxu1 %v2530_v31 }
 0x28a   : > { %1879 = vmatpush1.bf16.msra.mxu1 %v2528_v51 }
 0x28b   : > { %1880 = vmatprep.subr.bf16.mxu1 %v2536_v59 }
 0x28e   : > { %1881 = vmatpush1.bf16.msra.mxu1 %v2534_v11 }
 0x28f   : > { %1882 = vmatprep.subr.bf16.mxu1 %v2542_v13 }
 0x292   : > { %1883 = vmatpush1.bf16.msra.mxu1 %v2540_v21 }
 0x293   : > { %1884 = vmatprep.subr.bf16.mxu1 %v2548_v34 }
 0x296   : > { %1885 = vmatpush1.bf16.msra.mxu1 %v2546_v20 }
 0x297   : > { %1886 = vmatprep.subr.bf16.mxu1 %v2554_v39 }
 0x29a   : > { %1887 = vmatpush1.bf16.msra.mxu1 %v2552_v41 }
 0x29b   : > { %1888 = vmatprep.subr.bf16.mxu1 %v2560_v8 }
 0x29e   : > { %1889 = vmatpush1.bf16.msra.mxu1 %v2558_v62 }
 0x29f   : > { %1890 = vmatprep.subr.bf16.mxu1 %v2566_v14 }
 0x2a2   : > { %1891 = vmatpush1.bf16.msra.mxu1 %v2564_v5 }
 0x2a3   : > { %1892 = vmatprep.subr.bf16.mxu1 %v2572_v33 }
 0x2a6   : > { %1893 = vmatpush1.bf16.msra.mxu1 %v2570_v45 }
 0x34f   : > { %v1248_v38 = vpop.f32.mrb[0].mxu1 }
 0x350   : > { %v1249_v15 = vadd.f32 %v3458_v47, %v1248_v38  ;;  %v1250_v48 = vpop.f32.mrb[1].mxu1 }
 0x351   : > { %v1251_v22 = vpop.f32.mrb[2].mxu1 }
 0x352   : > { %v1263_v30 = vmax.f32 %v1249_v15, 0.0  ;;  %v1252_v42 = vadd.f32 %v3458_v47, %v1251_v22  ;;  %v1253_v10 = vpop.f32.mrb[3].mxu1 }
 0x354   : > { %v1271_v52 = vcombine.high %v1263_v30, %v1263_v30  ;;  %v1278_v46 = vrot.slane %v1263_v30, %v2937_v49  ;;  %v1264_v35 = vmax.f32 %v1252_v42, 0.0 }
 0x356   : > { %v1285_v27 = vrot.slane %v1271_v52, %v2937_v49  ;;  %v1286_v19 = vcombine.high %v1278_v46, %v1278_v46  ;;  %v1356_v1 = vsel %vm1355_vm15, %v1278_v46, -inf  ;;  %v1288_v56 = vcombine.high %v1264_v35, %v1264_v35 }
 0x357   : > { %v1357_v24 = vrot.slane %v1356_v1, 4  ;;  %v1295_v16 = vrot.slane %v1264_v35, %v2937_v49 }
 0x358   : > { %v1287_v57 = vcombine.high %v1285_v27, %v1285_v27  ;;  %v1363_v53 = vsel %vm1355_vm15, %v1286_v19, -inf  ;;  %v1370_v37 = vsel %vm1355_vm15, %v1285_v27, -inf  ;;  %v1302_v58 = vrot.slane %v1288_v56, %v2937_v49 }
 0x359   : > { %v1358_v17 = vmax.f32 %v1356_v1, %v1357_v24  ;;  %v1364_v61 = vrot.slane %v1363_v53, 4  ;;  %v1371_v36 = vrot.slane %v1370_v37, 4  ;;  %v1303_v23 = vcombine.high %v1295_v16, %v1295_v16 }
 0x35a   : > { %v1377_v55 = vsel %vm1355_vm15, %v1287_v57, -inf  ;;  %v1304_v6 = vcombine.high %v1302_v58, %v1302_v58  ;;  %v1384_v7 = vsel %vm1355_vm15, %v1295_v16, -inf  ;;  %v1398_v12 = vsel %vm1355_vm15, %v1302_v58, -inf  ;;  %v1256_v4 = vpop.f32.mrb[4].mxu1 }
 0x35b   : > { %v1359_v31 = vrot.slane %v1358_v17, 2  ;;  %v1365_v51 = vmax.f32 %v1363_v53, %v1364_v61  ;;  %v1372_v0 = vmax.f32 %v1370_v37, %v1371_v36  ;;  %v1378_v32 = vrot.slane %v1377_v55, 4  ;;  %v1258_v59 = vpop.f32.mrb[5].mxu1 }
 0x35c   : > { %v1385_v11 = vrot.slane %v1384_v7, 4  ;;  %v1391_v18 = vsel %vm1355_vm15, %v1303_v23, -inf  ;;  %v1399_v54 = vrot.slane %v1398_v12, 4  ;;  %v1405_v13 = vsel %vm1355_vm15, %v1304_v6, -inf  ;;  %v1259_v21 = vpop.f32.mrb[6].mxu1 }
 0x35d   : > { %v1360_v63 = vmax.f32 %v1358_v17, %v1359_v31  ;;  %v1366_v26 = vrot.slane %v1365_v51, 2  ;;  %v1373_v34 = vrot.slane %v1372_v0, 2  ;;  %v1379_v20 = vmax.f32 %v1377_v55, %v1378_v32  ;;  %v1261_v25 = vpop.f32.mrb[7].mxu1 }
 0x35e   : > { %v1386_v28 = vmax.f32 %v1384_v7, %v1385_v11  ;;  %v1392_v39 = vrot.slane %v1391_v18, 4  ;;  %v1400_v41 = vmax.f32 %v1398_v12, %v1399_v54  ;;  %v1406_v40 = vrot.slane %v1405_v13, 4 }
 0x35f   : > { %v1361_v43 = vrot.slane %v1360_v63, 1  ;;  %v1367_v8 = vmax.f32 %v1365_v51, %v1366_v26  ;;  %v1374_v62 = vmax.f32 %v1372_v0, %v1373_v34  ;;  %v1380_v2 = vrot.slane %v1379_v20, 2 }
 0x360   : > { %v1387_v60 = vrot.slane %v1386_v28, 2  ;;  %v1393_v14 = vmax.f32 %v1391_v18, %v1392_v39  ;;  %v1401_v5 = vrot.slane %v1400_v41, 2  ;;  %v1407_v50 = vmax.f32 %v1405_v13, %v1406_v40 }
 0x361   : > { %v1362_v9 = vmax.f32 %v1360_v63, %v1361_v43  ;;  %v1368_v33 = vrot.slane %v1367_v8, 1  ;;  %v1375_v45 = vrot.slane %v1374_v62, 1  ;;  %v1381_v3 = vmax.f32 %v1379_v20, %v1380_v2 }
 0x362   : > { %v1388_v29 = vmax.f32 %v1386_v28, %v1387_v60  ;;  %v1394_v38 = vrot.slane %v1393_v14, 2  ;;  %v1402_v15 = vmax.f32 %v1400_v41, %v1401_v5  ;;  %v1408_v48 = vrot.slane %v1407_v50, 2 }
 0x363   : > { %v1369_v22 = vmax.f32 %v1367_v8, %v1368_v33  ;;  %v1376_v30 = vmax.f32 %v1374_v62, %v1375_v45  ;;  %v1382_v42 = vrot.slane %v1381_v3, 1  ;;  %v1257_v10 = vadd.f32 %v3458_v47, %v1256_v4 }
 0x364   : > { %v1389_v52 = vrot.slane %v1388_v29, 1  ;;  %v1395_v46 = vmax.f32 %v1393_v14, %v1394_v38  ;;  %v1403_v35 = vrot.slane %v1402_v15, 1  ;;  %v1260_v27 = vadd.f32 %v3458_v47, %v1259_v21 }
 0x365   : > { %v3476_v19 = vmax.f32 %v1381_v3, %v1382_v42  ;;  %v1483_v1 = vsel %vm984_vm8, %v1369_v22, %v1362_v9  ;;  %v1500_v56 = vsel %vm996_vm7, %v1376_v30, %v1369_v22  ;;  %v1516_v24 = vsel %vm996_vm7, %v1369_v22, %v1362_v9 }
 0x366   : > { %v1484_v16 = vsel %vm986_vm9, %v1376_v30, %v1483_v1  ;;  %v3482_v57 = vmax.f32 %v1388_v29, %v1389_v52  ;;  %v1396_v53 = vrot.slane %v1395_v46, 1  ;;  %v1265_v37 = vmax.f32 %v1257_v10, 0.0 }
 0x367   : > { %v1485_v58 = vsel %vm988_vm10, %v3476_v19, %v1484_v16  ;;  %v1501_v47 = vsel %vm984_vm8, %v3476_v19, %v1500_v56  ;;  %v1266_v17 = vmax.f32 %v1260_v27, 0.0  ;;  %v3488_v61 = vmax.f32 %v1402_v15, %v1403_v35 }
 0x368   : > { %v3490_v36 = vmax.f32 %v1395_v46, %v1396_v53  ;;  %v1486_v23 = vsel %vm990_vm11, %v3482_v57, %v1485_v58  ;;  %v1502_v55 = vsel %vm986_vm9, %v3482_v57, %v1501_v47  ;;  %v1305_v6 = vcombine.high %v1265_v37, %v1265_v37 }
 0x369   : > { %v1312_v7 = vrot.slane %v1265_v37, %v2937_v49  ;;  %v1322_v12 = vcombine.high %v1266_v17, %v1266_v17  ;;  %v1329_v4 = vrot.slane %v1266_v17, %v2937_v49  ;;  %v3498_v31 = vmax.f32 %v1407_v50, %v1408_v48 }
 0x36a   : > { %v3502_v51 = vsel %vm992_vm12, %v3490_v36, %v1486_v23  ;;  %v3506_v0 = vsel %vm988_vm10, %v3490_v36, %v1502_v55  ;;  %v1319_v32 = vrot.slane %v1305_v6, %v2937_v49  ;;  %v3510_v59 = vsel %vm984_vm8, %v1376_v30, %v1516_v24 }
 0x36b   : > { %v1320_v11 = vcombine.high %v1312_v7, %v1312_v7  ;;  %v1412_v18 = vsel %vm1355_vm15, %v1312_v7, -inf  ;;  %v1336_v54 = vrot.slane %v1322_v12, %v2937_v49  ;;  %v1337_v13 = vcombine.high %v1329_v4, %v1329_v4 }
 0x36c   : > { %v1321_v21 = vcombine.high %v1319_v32, %v1319_v32  ;;  %v1413_v63 = vrot.slane %v1412_v18, 4  ;;  %v1426_v26 = vsel %vm1355_vm15, %v1319_v32, -inf  ;;  %v1440_v34 = vsel %vm1355_vm15, %v1329_v4, -inf }
 0x36d   : > { %v1419_v20 = vsel %vm1355_vm15, %v1320_v11, -inf  ;;  %v1427_v25 = vrot.slane %v1426_v26, 4  ;;  %v1338_v28 = vcombine.high %v1336_v54, %v1336_v54  ;;  %v1441_v39 = vrot.slane %v1440_v34, 4 }
 0x36e   : > { %v1414_v41 = vmax.f32 %v1412_v18, %v1413_v63  ;;  %v1420_v40 = vrot.slane %v1419_v20, 4  ;;  %v1433_v43 = vsel %vm1355_vm15, %v1321_v21, -inf  ;;  %v1447_v8 = vsel %vm1355_vm15, %v1337_v13, -inf }
 0x36f   : > { %v1428_v62 = vmax.f32 %v1426_v26, %v1427_v25  ;;  %v1434_v2 = vrot.slane %v1433_v43, 4  ;;  %v1442_v60 = vmax.f32 %v1440_v34, %v1441_v39  ;;  %v1448_v14 = vrot.slane %v1447_v8, 4 }
 0x370   : > { %v1415_v5 = vrot.slane %v1414_v41, 2  ;;  %v1421_v50 = vmax.f32 %v1419_v20, %v1420_v40  ;;  %v1454_v9 = vsel %vm1355_vm15, %v1336_v54, -inf  ;;  %v1461_v33 = vsel %vm1355_vm15, %v1338_v28, -inf }
 0x371   : > { %v1429_v45 = vrot.slane %v1428_v62, 2  ;;  %v1435_v3 = vmax.f32 %v1433_v43, %v1434_v2  ;;  %v1443_v29 = vrot.slane %v1442_v60, 2  ;;  %v1449_v38 = vmax.f32 %v1447_v8, %v1448_v14 }
 0x372   : > { %v1416_v15 = vmax.f32 %v1414_v41, %v1415_v5  ;;  %v1422_v48 = vrot.slane %v1421_v50, 2  ;;  %v1455_v22 = vrot.slane %v1454_v9, 4  ;;  %v1462_v30 = vrot.slane %v1461_v33, 4 }
 0x373   : > { %v1430_v42 = vmax.f32 %v1428_v62, %v1429_v45  ;;  %v1436_v10 = vrot.slane %v1435_v3, 2  ;;  %v1444_v52 = vmax.f32 %v1442_v60, %v1443_v29  ;;  %v1450_v46 = vrot.slane %v1449_v38, 2 }
 0x374   : > { %v1417_v35 = vrot.slane %v1416_v15, 1  ;;  %v1423_v27 = vmax.f32 %v1421_v50, %v1422_v48  ;;  %v1456_v1 = vmax.f32 %v1454_v9, %v1455_v22  ;;  %v1463_v56 = vmax.f32 %v1461_v33, %v1462_v30 }
 0x375   : > { %v1431_v24 = vrot.slane %v1430_v42, 1  ;;  %v1437_v16 = vmax.f32 %v1435_v3, %v1436_v10  ;;  %v1445_v53 = vrot.slane %v1444_v52, 1  ;;  %v1451_v37 = vmax.f32 %v1449_v38, %v1450_v46 }
 0x376   : > { %v1418_v58 = vmax.f32 %v1416_v15, %v1417_v35  ;;  %v1424_v47 = vrot.slane %v1423_v27, 1  ;;  %v1457_v17 = vrot.slane %v1456_v1, 2  ;;  %v1464_v23 = vrot.slane %v1463_v56, 2 }
 0x377   : > { %v1432_v55 = vmax.f32 %v1430_v42, %v1431_v24  ;;  %v1438_v6 = vrot.slane %v1437_v16, 1  ;;  %v1446_v7 = vmax.f32 %v1444_v52, %v1445_v53  ;;  %v1452_v12 = vrot.slane %v1451_v37, 1  ;;  %v1583_v52 = vld [vmem:[#allocation6] sm:$0x3] }
 0x378   : > { %v1425_v4 = vmax.f32 %v1423_v27, %v1424_v47  ;;  %v1458_v32 = vmax.f32 %v1456_v1, %v1457_v17  ;;  %v1410_v11 = vrot.slane %v3498_v31, 1  ;;  %v1465_v18 = vmax.f32 %v1463_v56, %v1464_v23 }
 0x379   : > { %v1439_v54 = vmax.f32 %v1437_v16, %v1438_v6  ;;  %v1453_v13 = vmax.f32 %v1451_v37, %v1452_v12  ;;  %v1488_v21 = vsel %vm994_vm13, %v3488_v61, %v3502_v51  ;;  %v1504_v63 = vsel %vm990_vm11, %v3488_v61, %v3506_v0 }
 0x37a   : > { %v1507_v26 = vsel %vm996_vm7, %v1432_v55, %v1425_v4  ;;  %v1523_v34 = vsel %vm996_vm7, %v1425_v4, %v1418_v58  ;;  %v1459_v20 = vrot.slane %v1458_v32, 1  ;;  %v1411_v25 = vmax.f32 %v3498_v31, %v1410_v11 }
 0x37b   : > { %v1508_v28 = vsel %vm984_vm8, %v1439_v54, %v1507_v26  ;;  %v1466_v39 = vrot.slane %v1465_v18, 1  ;;  %v1518_v41 = vsel %vm986_vm9, %v3476_v19, %v3510_v59  ;;  %v1524_v51 = vsel %vm984_vm8, %v1432_v55, %v1523_v34 }
 0x37c   : > { %v1509_v40 = vsel %vm986_vm9, %v1446_v7, %v1508_v28  ;;  %v1460_v43 = vmax.f32 %v1458_v32, %v1459_v20  ;;  %v1489_v0 = vsel %vm996_vm7, %v1418_v58, %v1411_v25  ;;  %v1505_v8 = vsel %vm992_vm12, %v1411_v25, %v1504_v63 }
 0x37d   : > { %v1510_v62 = vsel %vm988_vm10, %v1453_v13, %v1509_v40  ;;  %v1467_v2 = vmax.f32 %v1465_v18, %v1466_v39  ;;  %v1490_v31 = vsel %vm984_vm8, %v1425_v4, %v1489_v0  ;;  %v1506_v60 = vsel %vm994_vm13, %v1418_v58, %v1505_v8 }
 0x37e   : > { %v1491_v14 = vsel %vm986_vm9, %v1432_v55, %v1490_v31  ;;  %v1511_v19 = vsel %vm990_vm11, %v1460_v43, %v1510_v62  ;;  %v1519_v59 = vsel %vm988_vm10, %v3482_v57, %v1518_v41  ;;  %v1525_v5 = vsel %vm986_vm9, %v1439_v54, %v1524_v51 }
 0x37f   : > { %v1492_v50 = vsel %vm988_vm10, %v1439_v54, %v1491_v14  ;;  %v1512_v9 = vsel %vm992_vm12, %v1467_v2, %v1511_v19  ;;  %v1520_v33 = vsel %vm990_vm11, %v3490_v36, %v1519_v59  ;;  %v1526_v45 = vsel %vm988_vm10, %v1446_v7, %v1525_v5 }
 0x380   : > { %v1521_v3 = vsel %vm992_vm12, %v3488_v61, %v1520_v33  ;;  %v1527_v29 = vsel %vm990_vm11, %v1453_v13, %v1526_v45  ;;  %v2366_v57 = vpack.c.bf16 %v1512_v9, %v1506_v60  ;;  %v1493_v38 = vsel %vm990_vm11, %v1446_v7, %v1492_v50 }
 0x381   : > { %v1522_v15 = vsel %vm994_vm13, %v1411_v25, %v1521_v3  ;;  %v1528_v48 = vsel %vm992_vm12, %v1460_v43, %v1527_v29  ;;  %v1494_v36 = vsel %vm992_vm12, %v1453_v13, %v1493_v38  ;;  %v1587_v10 = vsub.s32 0, %v2927_v44 }
 0x382   : > { %v1529_v22 = vsel %vm994_vm13, %v1467_v2, %v1528_v48  ;;  %2367 = vmatmul.mubr.msk.bf16.vlgmr.msra.gmra.mrb[8].mxu1 %vm2365_vm3, %v2366_v57  ;;  %v1495_v30 = vsel %vm994_vm13, %v1460_v43, %v1494_v36  ;;  %v1591_v46 = vsub.s32 1, %v2927_v44 }
 0x383   : > { %v1533_v42 = vpack.c.bf16 %v1529_v22, %v1522_v15  ;;  %v2363_v61 = vpack.c.bf16 %v1495_v30, %v1488_v21  ;;  %v1588_v27 = vrot.slane %v1583_v52, %v1587_v10 }
 0x384   : > { %v1592_v56 = vrot.slane %v1583_v52, %v1591_v46 }
 0x385   : > { %1867 = vmatprep.mubr.bf16.mxu0 %v1533_v42 }
 0x386   : > { %2364 = vmatmul.mubr.msk.bf16.vlgmr.msra.gmra.mrb[8].mxu0 %vm2362_vm0, %v2363_v61 }
 0x455   : > { %v1912_v35 = vpop.f32.mrb[8].mxu1 }
 0x456   : > { %v1914_v1 = vpop.f32.mrb[9].mxu1 }
 0x457   : > { %v1916_v24 = vpop.f32.mrb[10].mxu1 }
 0x458   : > { %v1918_v16 = vpop.f32.mrb[11].mxu1 }
 0x459   : > { %v1869_v53 = vpop.f32.mrb[8].mxu0 }
 0x45a   : > { %v1870_v37 = vadd.f32 %v1869_v53, %v1588_v27  ;;  %v1871_v58 = vpop.f32.mrb[9].mxu0 }
 0x45b   : > { %v1872_v47 = vadd.f32 %v1871_v58, %v1592_v56  ;;  %v1873_v17 = vpop.f32.mrb[10].mxu0 }
 0x45c   : > { %v1913_v23 = vadd.f32 %v1912_v35, %v1870_v37  ;;  %v1874_v55 = vadd.f32 %v1873_v17, %v1588_v27  ;;  %v1875_v6 = vpop.f32.mrb[11].mxu0 }
 0x45d   : > { %v1915_v7 = vadd.f32 %v1914_v1, %v1872_v47  ;;  %v1876_v12 = vadd.f32 %v1875_v6, %v1592_v56 }
 0x45e   : > { %v1921_v4 = vmax.f32 %v1913_v23, 0.0  ;;  %v1917_v32 = vadd.f32 %v1916_v24, %v1874_v55 }
 0x45f   : > { %v1922_v11 = vmax.f32 %v1915_v7, 0.0  ;;  %v1919_v44 = vadd.f32 %v1918_v16, %v1876_v12 }
 0x460   : > { %v1923_v18 = vmax.f32 %v1917_v32, 0.0 }
 0x461   : > { %v1929_v54 = vcombine.low %v1921_v4, %v1922_v11  ;;  %v1930_v13 = vcombine.high %v1921_v4, %v1922_v11  ;;  %v1924_v21 = vmax.f32 %v1919_v44, 0.0 }
 0x463   : > { %v1937_v63 = vrot.slane %v1929_v54, %v2937_v49  ;;  %v1944_v26 = vrot.slane %v1930_v13, %v2937_v49  ;;  %v1947_v34 = vcombine.low %v1923_v18, %v1924_v21  ;;  %v1948_v20 = vcombine.high %v1923_v18, %v1924_v21 }
 0x465   : > { %v1945_v25 = vcombine.high %v1937_v63, %v1937_v63  ;;  %v1946_v28 = vcombine.high %v1944_v26, %v1944_v26  ;;  %v1971_v39 = vrot.slane %v1937_v63, %v2937_v49  ;;  %v1987_v41 = vrot.slane %v1944_v26, %v2937_v49 }
 0x466   : > { %v3570_v51 = vrot.slane %v1947_v34, %v2937_v49  ;;  %v3573_v40 = vrot.slane %v1948_v20, %v2937_v49 }
 0x467   : > { %v1972_v43 = vcombine.high %v1971_v39, %v1971_v39  ;;  %v1979_v0 = vrot.slane %v1945_v25, %v2937_v49  ;;  %v1988_v8 = vcombine.high %v1987_v41, %v1987_v41  ;;  %v1995_v62 = vrot.slane %v1946_v28, %v2937_v49 }
 0x468   : > { %v2045_v2 = vsel %vm1355_vm15, %v1971_v39, -inf  ;;  %v2073_v31 = vsel %vm1355_vm15, %v1987_v41, -inf  ;;  %v1963_v60 = vcombine.high %v3570_v51, %v3570_v51  ;;  %v1964_v14 = vcombine.high %v3573_v40, %v3573_v40 }
 0x469   : > { %v1980_v19 = vcombine.high %v1979_v0, %v1979_v0  ;;  %v1996_v59 = vcombine.high %v1995_v62, %v1995_v62  ;;  %v2046_v5 = vrot.slane %v2045_v2, 4  ;;  %v2052_v50 = vsel %vm1355_vm15, %v1972_v43, -inf }
 0x46a   : > { %v2053_v9 = vrot.slane %v2052_v50, 4  ;;  %v2059_v33 = vsel %vm1355_vm15, %v1979_v0, -inf  ;;  %v2074_v45 = vrot.slane %v2073_v31, 4  ;;  %v2080_v3 = vsel %vm1355_vm15, %v1988_v8, -inf }
 0x46b   : > { %v2047_v29 = vmax.f32 %v2045_v2, %v2046_v5  ;;  %v2060_v57 = vrot.slane %v2059_v33, 4  ;;  %v2066_v38 = vsel %vm1355_vm15, %v1980_v19, -inf  ;;  %v2081_v15 = vrot.slane %v2080_v3, 4 }
 0x46c   : > { %v2054_v48 = vmax.f32 %v2052_v50, %v2053_v9  ;;  %v2067_v36 = vrot.slane %v2066_v38, 4  ;;  %v2075_v22 = vmax.f32 %v2073_v31, %v2074_v45  ;;  %v2087_v30 = vsel %vm1355_vm15, %v1995_v62, -inf }
 0x46d   : > { %v2048_v42 = vrot.slane %v2047_v29, 2  ;;  %v2061_v61 = vmax.f32 %v2059_v33, %v2060_v57  ;;  %v2082_v10 = vmax.f32 %v2080_v3, %v2081_v15  ;;  %v2088_v52 = vrot.slane %v2087_v30, 4 }
 0x46e   : > { %v2055_v46 = vrot.slane %v2054_v48, 2  ;;  %v2068_v35 = vmax.f32 %v2066_v38, %v2067_v36  ;;  %v2076_v27 = vrot.slane %v2075_v22, 2  ;;  %v2094_v1 = vsel %vm1355_vm15, %v1996_v59, -inf }
 0x46f   : > { %v2049_v56 = vmax.f32 %v2047_v29, %v2048_v42  ;;  %v2062_v24 = vrot.slane %v2061_v61, 2  ;;  %v2083_v16 = vrot.slane %v2082_v10, 2  ;;  %v2089_v53 = vmax.f32 %v2087_v30, %v2088_v52 }
 0x470   : > { %v2056_v37 = vmax.f32 %v2054_v48, %v2055_v46  ;;  %v2069_v58 = vrot.slane %v2068_v35, 2  ;;  %v2077_v47 = vmax.f32 %v2075_v22, %v2076_v27  ;;  %v2095_v17 = vrot.slane %v2094_v1, 4 }
 0x471   : > { %v2050_v23 = vrot.slane %v2049_v56, 1  ;;  %v2063_v55 = vmax.f32 %v2061_v61, %v2062_v24  ;;  %v2084_v6 = vmax.f32 %v2082_v10, %v2083_v16  ;;  %v2090_v7 = vrot.slane %v2089_v53, 2 }
 0x472   : > { %v2057_v12 = vrot.slane %v2056_v37, 1  ;;  %v2070_v4 = vmax.f32 %v2068_v35, %v2069_v58  ;;  %v2078_v32 = vrot.slane %v2077_v47, 1  ;;  %v2096_v11 = vmax.f32 %v2094_v1, %v2095_v17 }
 0x473   : > { %v2051_v44 = vmax.f32 %v2049_v56, %v2050_v23  ;;  %v2064_v18 = vrot.slane %v2063_v55, 1  ;;  %v2085_v54 = vrot.slane %v2084_v6, 1  ;;  %v2091_v13 = vmax.f32 %v2089_v53, %v2090_v7 }
 0x474   : > { %v2058_v21 = vmax.f32 %v2056_v37, %v2057_v12  ;;  %v2071_v63 = vrot.slane %v2070_v4, 1  ;;  %v2079_v26 = vmax.f32 %v2077_v47, %v2078_v32  ;;  %v2097_v34 = vrot.slane %v2096_v11, 2 }
 0x475   : > { %v2065_v20 = vmax.f32 %v2063_v55, %v2064_v18  ;;  %v2086_v25 = vmax.f32 %v2084_v6, %v2085_v54  ;;  %v2092_v28 = vrot.slane %v2091_v13, 1  ;;  %v2003_v39 = vrot.slane %v3570_v51, %v2937_v49 }
 0x476   : > { %v2072_v41 = vmax.f32 %v2070_v4, %v2071_v63  ;;  %v2098_v43 = vmax.f32 %v2096_v11, %v2097_v34  ;;  %v2011_v0 = vrot.slane %v1963_v60, %v2937_v49  ;;  %v2019_v8 = vrot.slane %v3573_v40, %v2937_v49 }
 0x477   : > { %v2093_v62 = vmax.f32 %v2091_v13, %v2092_v28  ;;  %v2173_v2 = vsel %vm996_vm7, %v2065_v20, %v2051_v44  ;;  %v2004_v31 = vcombine.high %v2003_v39, %v2003_v39  ;;  %v2027_v19 = vrot.slane %v1964_v14, %v2937_v49 }
 0x478   : > { %v2099_v59 = vrot.slane %v2098_v43, 1  ;;  %v2174_v5 = vsel %vm984_vm8, %v2079_v26, %v2173_v2  ;;  %v2180_v50 = vsel %vm996_vm7, %v2072_v41, %v2058_v21  ;;  %v2012_v9 = vcombine.high %v2011_v0, %v2011_v0 }
 0x479   : > { %v2175_v51 = vsel %vm986_vm9, %v2093_v62, %v2174_v5  ;;  %v2181_v33 = vsel %vm984_vm8, %v2086_v25, %v2180_v50  ;;  %v2020_v60 = vcombine.high %v2019_v8, %v2019_v8  ;;  %v2028_v45 = vcombine.high %v2027_v19, %v2027_v19 }
 0x47a   : > { %v2100_v3 = vmax.f32 %v2098_v43, %v2099_v59  ;;  %v2101_v40 = vsel %vm1355_vm15, %v2003_v39, -inf  ;;  %v2108_v29 = vsel %vm1355_vm15, %v2004_v31, -inf  ;;  %v2115_v57 = vsel %vm1355_vm15, %v2011_v0, -inf }
 0x47b   : > { %v2102_v49 = vrot.slane %v2101_v40, 4  ;;  %v2109_v14 = vrot.slane %v2108_v29, 4  ;;  %v2116_v38 = vrot.slane %v2115_v57, 4  ;;  %v2122_v15 = vsel %vm1355_vm15, %v2012_v9, -inf }
 0x47c   : > { %v2182_v48 = vsel %vm986_vm9, %v2100_v3, %v2181_v33  ;;  %v2123_v36 = vrot.slane %v2122_v15, 4  ;;  %v2129_v22 = vsel %vm1355_vm15, %v2019_v8, -inf  ;;  %v2136_v30 = vsel %vm1355_vm15, %v2020_v60, -inf }
 0x47d   : > { %v2103_v42 = vmax.f32 %v2101_v40, %v2102_v49  ;;  %v2110_v61 = vmax.f32 %v2108_v29, %v2109_v14  ;;  %v2117_v10 = vmax.f32 %v2115_v57, %v2116_v38  ;;  %v2130_v52 = vrot.slane %v2129_v22, 4 }
 0x47e   : > { %v2124_v46 = vmax.f32 %v2122_v15, %v2123_v36  ;;  %v2137_v35 = vrot.slane %v2136_v30, 4  ;;  %v2143_v27 = vsel %vm1355_vm15, %v2027_v19, -inf  ;;  %v2150_v1 = vsel %vm1355_vm15, %v2028_v45, -inf }
 0x47f   : > { %v2104_v56 = vrot.slane %v2103_v42, 2  ;;  %v2111_v24 = vrot.slane %v2110_v61, 2  ;;  %v2118_v16 = vrot.slane %v2117_v10, 2  ;;  %v2131_v53 = vmax.f32 %v2129_v22, %v2130_v52 }
 0x480   : > { %v2125_v37 = vrot.slane %v2124_v46, 2  ;;  %v2138_v58 = vmax.f32 %v2136_v30, %v2137_v35  ;;  %v2144_v47 = vrot.slane %v2143_v27, 4  ;;  %v2151_v17 = vrot.slane %v2150_v1, 4 }
 0x481   : > { %v2105_v23 = vmax.f32 %v2103_v42, %v2104_v56  ;;  %v2112_v55 = vmax.f32 %v2110_v61, %v2111_v24  ;;  %v2119_v6 = vmax.f32 %v2117_v10, %v2118_v16  ;;  %v2132_v7 = vrot.slane %v2131_v53, 2 }
 0x482   : > { %v2126_v12 = vmax.f32 %v2124_v46, %v2125_v37  ;;  %v2139_v4 = vrot.slane %v2138_v58, 2  ;;  %v2145_v32 = vmax.f32 %v2143_v27, %v2144_v47  ;;  %v2152_v11 = vmax.f32 %v2150_v1, %v2151_v17 }
 0x483   : > { %v2106_v44 = vrot.slane %v2105_v23, 1  ;;  %v2113_v18 = vrot.slane %v2112_v55, 1  ;;  %v2120_v54 = vrot.slane %v2119_v6, 1  ;;  %v2133_v13 = vmax.f32 %v2131_v53, %v2132_v7 }
 0x484   : > { %v2127_v21 = vrot.slane %v2126_v12, 1  ;;  %v2140_v63 = vmax.f32 %v2138_v58, %v2139_v4  ;;  %v2146_v26 = vrot.slane %v2145_v32, 2  ;;  %v2153_v34 = vrot.slane %v2152_v11, 2 }
 0x485   : > { %v2107_v20 = vmax.f32 %v2105_v23, %v2106_v44  ;;  %v2114_v25 = vmax.f32 %v2112_v55, %v2113_v18  ;;  %v2134_v28 = vrot.slane %v2133_v13, 1  ;;  %v2121_v39 = vmax.f32 %v2119_v6, %v2120_v54 }
 0x486   : > { %v2141_v41 = vrot.slane %v2140_v63, 1  ;;  %v2147_v43 = vmax.f32 %v2145_v32, %v2146_v26  ;;  %v2154_v0 = vmax.f32 %v2152_v11, %v2153_v34  ;;  %v2128_v8 = vmax.f32 %v2126_v12, %v2127_v21 }
 0x487   : > { %v2135_v62 = vmax.f32 %v2133_v13, %v2134_v28  ;;  %v2176_v2 = vsel %vm988_vm10, %v2107_v20, %v2175_v51  ;;  %v2183_v31 = vsel %vm988_vm10, %v2114_v25, %v2182_v48 }
 0x488   : > { %v2142_v19 = vmax.f32 %v2140_v63, %v2141_v41  ;;  %v2148_v59 = vrot.slane %v2147_v43, 1  ;;  %v2155_v5 = vrot.slane %v2154_v0, 1  ;;  %v2177_v50 = vsel %vm990_vm11, %v2121_v39, %v2176_v2 }
 0x489   : > { %v2178_v9 = vsel %vm992_vm12, %v2135_v62, %v2177_v50  ;;  %v2184_v33 = vsel %vm990_vm11, %v2128_v8, %v2183_v31 }
 0x48a   : > { %v2149_v60 = vmax.f32 %v2147_v43, %v2148_v59  ;;  %v2156_v45 = vmax.f32 %v2154_v0, %v2155_v5  ;;  %v2185_v3 = vsel %vm992_vm12, %v2142_v19, %v2184_v33 }
 0x48c   : > { %v2179_v51 = vsel %vm994_vm13, %v2149_v60, %v2178_v9  ;;  %v2186_v40 = vsel %vm994_vm13, %v2156_v45, %v2185_v3 }
 0x48d   : > { %2189 = vst [vmem:[%s316_s13] sm:$0xff] %v2179_v51  ;;  %2190 = vst [vmem:[%s316_s13 + $0x8] sm:$0xff] %v2186_v40 }
 0x48e PF: > { %s19_s24 = sadd.s32 1, %s2674_s24  }
 0x48f   : > { %p16_p5 = scmp.ge.s32.totalorder %s19_s24, 4  }
 0x491   :  { %18 = sbr.rel (!%p16_p5) target bundleno = 2 (0x2), region = 91 }
 0x498   :  { %2212 = vsyncpa [#allocation3], 1 }
 0x499   :  { %2214 = vsyncpa [#allocation3 + $0x1], 1 }
 0x49a   :  { %2215 = vsyncpa [#allocation5], 1 }

// kernel: _lambda_.3
= control target key start
LH: loop header
LB: loop body
LE: loop exit
PB: predicated region body
PF: predicated region fallthrough
CT: control target
= control target key end

     0   :  { %10 = vsyncpa [#allocation4], 0  ;;  %s1346_s18 = smov 0   ;;  %s1527_s0 = inlined_call_operand.vmem [shape: f32[2,2048], index: 0, kind: input, shape index: {}]   ;;  %s1528_s1 = inlined_call_operand.vmem [shape: bf16[2048,256], index: 1, kind: input, shape index: {}]   ;;  %s1529_s2 = inlined_call_operand.vmem [shape: f32[1,256], index: 2, kind: input, shape index: {}]   ;;  %s1530_s3 = inlined_call_operand.vmem [shape: bf16[256,128], index: 3, kind: input, shape index: {}]   ;;  %s1531_s4 = inlined_call_operand.vmem [shape: f32[1,128], index: 4, kind: input, shape index: {}]   ;;  %s1532_s5 = inlined_call_operand.hbm [shape: f32[2,128], index: 5, kind: output, shape index: {}]  }
   0x1 LB: > { %s1352_s19 = sadd.s32 4294967295, %s1311_s18   ;;  %p1027_p0 = scmp.ge.s32.totalorder %s1311_s18, 1  ;;  %s1311_s18 = sphi %s1346_s18, %s16_s18  }
   0x2   : > { %p196_p1 = scmp.lt.s32.totalorder %s1311_s18, 5 }
   0x4   : > { %p197_p2 = pnand %p1027_p0, %p196_p1 }
   0x5   : > { %s1028_s20 = sshll.u32 (!%p197_p2), %s1352_s19, 2  ;;  %s1030_s21 = sshll.u32 (!%p197_p2), %s1352_s19, 6 }
   0x6   : > { %200 = sbr.rel (%p197_p2) target bundleno = 572 (0x23c), region = 40  ;;  %p226_p3 = scmp.lt.s32.totalorder (!%p197_p2), %s1028_s20, 15 }
   0x7   : > { %p232_p4 = scmp.lt.s32.totalorder (!%p197_p2), %s1030_s21, 255  ;;  %p1033_p5 = scmp.ne.s32.totalorder (!%p197_p2), %s1352_s19, 0 }
   0xd   : > { %s1534_s20 = smov (!%p226_p3, %s1028_s20), 15  ;;  %s1536_s21 = smov (!%p232_p4, %s1030_s21), 255 }
   0xe   : > { %s1029_s22 = sshll.u32 %s1534_s20, 1  ;;  %s1120_s26 = sshll.u32 %s1536_s21, 3  ;;  %v1313_v0 = vmov (!%p1033_p5), 0.0  }
   0xf   : > { %s1361_s25 = scalar_lea.vmem %s1527_s0, %s1029_s22  ;;  %s1366_s29 = scalar_lea.vmem %s1528_s1, %s1120_s26  ;;  %243 = vst [vmem:[#allocation2] sm:$0xf] (!%p1033_p5), %v1313_v0 }
  0x10   : > { %242 = sbr.rel (%p1033_p5) target bundleno = 23 (0x17), region = 44 }
  0x17 PF: > { %v1162_v1 = vld [vmem:[%s1366_s29 + $0x4] ss:$8 sps:$4 sm:$0xff]   ;;  %v1166_v3 = vld [vmem:[%s1366_s29] ss:$8 sps:$4 sm:$0xff]   ;;  %v1168_v5 = vld [vmem:[%s1366_s29 + $0x14] ss:$8 sps:$4 sm:$0xff]   ;;  %v251_v39 = vlaneseq }
  0x18   : > { %v1164_v2 = vld [vmem:[%s1366_s29 + $0x104] ss:$8 sps:$4 sm:$0xff]   ;;  %656 = vmatprep.subr.bf16.mxu1 %v1162_v1  ;;  %v1167_v4 = vld [vmem:[%s1366_s29 + $0x100] ss:$8 sps:$4 sm:$0xff]   ;;  %v1170_v6 = vld [vmem:[%s1366_s29 + $0x114] ss:$8 sps:$4 sm:$0xff]  }
  0x19   : > { %697 = vmatprep.subr.bf16.mxu0 %v1164_v2  ;;  %657 = vmatpush1.bf16.msra.mxu1 %v1166_v3  ;;  %v1172_v7 = vld [vmem:[%s1366_s29 + $0x10] ss:$8 sps:$4 sm:$0xff]   ;;  %v1174_v9 = vld [vmem:[%s1366_s29 + $0x24] ss:$8 sps:$4 sm:$0xff]   ;;  %v1178_v11 = vld [vmem:[%s1366_s29 + $0x20] ss:$8 sps:$4 sm:$0xff]  }
  0x1a   : > { %698 = vmatpush1.bf16.msra.mxu0 %v1167_v4  ;;  %658 = vmatprep.subr.bf16.mxu1 %v1168_v5  ;;  %v1173_v8 = vld [vmem:[%s1366_s29 + $0x110] ss:$8 sps:$4 sm:$0xff]   ;;  %v1176_v10 = vld [vmem:[%s1366_s29 + $0x124] ss:$8 sps:$4 sm:$0xff]   ;;  %v1179_v12 = vld [vmem:[%s1366_s29 + $0x120] ss:$8 sps:$4 sm:$0xff]  }
  0x1b   : > { %699 = vmatprep.subr.bf16.mxu0 %v1170_v6  ;;  %v1180_v13 = vld [vmem:[%s1366_s29 + $0x34] ss:$8 sps:$4 sm:$0xff]   ;;  %v1184_v15 = vld [vmem:[%s1366_s29 + $0x30] ss:$8 sps:$4 sm:$0xff]   ;;  %v1186_v17 = vld [vmem:[%s1366_s29 + $0x44] ss:$8 sps:$4 sm:$0xff]  }
  0x1c   : > { %v1182_v14 = vld [vmem:[%s1366_s29 + $0x134] ss:$8 sps:$4 sm:$0xff]   ;;  %v1185_v16 = vld [vmem:[%s1366_s29 + $0x130] ss:$8 sps:$4 sm:$0xff]   ;;  %v1188_v18 = vld [vmem:[%s1366_s29 + $0x144] ss:$8 sps:$4 sm:$0xff]  }
  0x1d   : > { %659 = vmatpush1.bf16.msra.mxu1 %v1172_v7  ;;  %v1190_v19 = vld [vmem:[%s1366_s29 + $0x40] ss:$8 sps:$4 sm:$0xff]   ;;  %v1192_v21 = vld [vmem:[%s1366_s29 + $0x54] ss:$8 sps:$4 sm:$0xff]   ;;  %v1196_v23 = vld [vmem:[%s1366_s29 + $0x50] ss:$8 sps:$4 sm:$0xff]  }
  0x1e   : > { %700 = vmatpush1.bf16.msra.mxu0 %v1173_v8  ;;  %660 = vmatprep.subr.bf16.mxu1 %v1174_v9  ;;  %v1191_v20 = vld [vmem:[%s1366_s29 + $0x140] ss:$8 sps:$4 sm:$0xff]   ;;  %v1194_v22 = vld [vmem:[%s1366_s29 + $0x154] ss:$8 sps:$4 sm:$0xff]   ;;  %v1197_v24 = vld [vmem:[%s1366_s29 + $0x150] ss:$8 sps:$4 sm:$0xff]  }
  0x1f   : > { %701 = vmatprep.subr.bf16.mxu0 %v1176_v10  ;;  %v1198_v25 = vld [vmem:[%s1366_s29 + $0x64] ss:$8 sps:$4 sm:$0xff]   ;;  %v1202_v27 = vld [vmem:[%s1366_s29 + $0x60] ss:$8 sps:$4 sm:$0xff]   ;;  %v1204_v29 = vld [vmem:[%s1366_s29 + $0x74] ss:$8 sps:$4 sm:$0xff]  }
  0x20   : > { %v1200_v26 = vld [vmem:[%s1366_s29 + $0x164] ss:$8 sps:$4 sm:$0xff]   ;;  %v1203_v28 = vld [vmem:[%s1366_s29 + $0x160] ss:$8 sps:$4 sm:$0xff]   ;;  %v1206_v30 = vld [vmem:[%s1366_s29 + $0x174] ss:$8 sps:$4 sm:$0xff]  }
  0x21   : > { %661 = vmatpush1.bf16.msra.mxu1 %v1178_v11  ;;  %v1208_v31 = vld [vmem:[%s1366_s29 + $0x70] ss:$8 sps:$4 sm:$0xff]   ;;  %v1210_v33 = vld [vmem:[%s1366_s29 + $0x84] ss:$8 sps:$4 sm:$0xff]   ;;  %v1214_v35 = vld [vmem:[%s1366_s29 + $0x80] ss:$8 sps:$4 sm:$0xff]  }
  0x22   : > { %702 = vmatpush1.bf16.msra.mxu0 %v1179_v12  ;;  %662 = vmatprep.subr.bf16.mxu1 %v1180_v13  ;;  %v1209_v32 = vld [vmem:[%s1366_s29 + $0x170] ss:$8 sps:$4 sm:$0xff]   ;;  %v1212_v34 = vld [vmem:[%s1366_s29 + $0x184] ss:$8 sps:$4 sm:$0xff]   ;;  %v1215_v36 = vld [vmem:[%s1366_s29 + $0x180] ss:$8 sps:$4 sm:$0xff]  }
  0x23   : > { %703 = vmatprep.subr.bf16.mxu0 %v1182_v14  ;;  %v1314_v37 = vmov 1983009808   ;;  %v1216_v40 = vld [vmem:[%s1366_s29 + $0x94] ss:$8 sps:$4 sm:$0xff]   ;;  %v1220_v42 = vld [vmem:[%s1366_s29 + $0x90] ss:$8 sps:$4 sm:$0xff]  }
  0x24   : > { %v249_v38 = vunpack.c.l.s4 %v1314_v37  ;;  %v1218_v41 = vld [vmem:[%s1366_s29 + $0x194] ss:$8 sps:$4 sm:$0xff]   ;;  %v1408_v44 = vshrl.u32 %v251_v39, 7  ;;  %v1221_v45 = vld [vmem:[%s1366_s29 + $0x190] ss:$8 sps:$4 sm:$0xff]   ;;  %v245_v53 = vld [vmem:[%s1361_s25] sm:$0xff] }
  0x25   : > { %663 = vmatpush1.bf16.msra.mxu1 %v1184_v15  ;;  %v1222_v46 = vld [vmem:[%s1366_s29 + $0xa4] ss:$8 sps:$4 sm:$0xff]   ;;  %v1226_v48 = vld [vmem:[%s1366_s29 + $0xa0] ss:$8 sps:$4 sm:$0xff]   ;;  %v1228_v51 = vld [vmem:[%s1366_s29 + $0xb4] ss:$8 sps:$4 sm:$0xff]   ;;  %v247_v55 = vcombine.high %v245_v53, %v245_v53 }
  0x26   : > { %704 = vmatpush1.bf16.msra.mxu0 %v1185_v16  ;;  %664 = vmatprep.subr.bf16.mxu1 %v1186_v17  ;;  %v250_v43 = vunpack.c.0.s8 %v249_v38  ;;  %v1224_v47 = vld [vmem:[%s1366_s29 + $0x1a4] ss:$8 sps:$4 sm:$0xff]   ;;  %v1227_v49 = vld [vmem:[%s1366_s29 + $0x1a0] ss:$8 sps:$4 sm:$0xff]   ;;  %v1230_v52 = vld [vmem:[%s1366_s29 + $0x1b4] ss:$8 sps:$4 sm:$0xff]  }
  0x27   : > { %705 = vmatprep.subr.bf16.mxu0 %v1188_v18  ;;  %v1232_v56 = vld [vmem:[%s1366_s29 + $0xb0] ss:$8 sps:$4 sm:$0xff]   ;;  %v1234_v58 = vld [vmem:[%s1366_s29 + $0xc4] ss:$8 sps:$4 sm:$0xff]   ;;  %v1238_v0 = vld [vmem:[%s1366_s29 + $0xc0] ss:$8 sps:$4 sm:$0xff]  }
  0x28   : > { %v1416_v50 = vsub.s32 %v250_v43, %v1408_v44  ;;  %v1233_v57 = vld [vmem:[%s1366_s29 + $0x1b0] ss:$8 sps:$4 sm:$0xff]   ;;  %v1236_v59 = vld [vmem:[%s1366_s29 + $0x1c4] ss:$8 sps:$4 sm:$0xff]   ;;  %v1239_v1 = vld [vmem:[%s1366_s29 + $0x1c0] ss:$8 sps:$4 sm:$0xff]  }
  0x29   : > { %665 = vmatpush1.bf16.msra.mxu1 %v1190_v19  ;;  %v1240_v2 = vld [vmem:[%s1366_s29 + $0xd4] ss:$8 sps:$4 sm:$0xff]   ;;  %v1244_v5 = vld [vmem:[%s1366_s29 + $0xd0] ss:$8 sps:$4 sm:$0xff]   ;;  %v1246_v7 = vld [vmem:[%s1366_s29 + $0xe4] ss:$8 sps:$4 sm:$0xff]  }
  0x2a   : > { %706 = vmatpush1.bf16.msra.mxu0 %v1191_v20  ;;  %666 = vmatprep.subr.bf16.mxu1 %v1192_v21  ;;  %v254_v54 = vrot.slane %v245_v53, %v1416_v50  ;;  %v261_v61 = vrot.slane %v247_v55, %v1416_v50  ;;  %v1242_v3 = vld [vmem:[%s1366_s29 + $0x1d4] ss:$8 sps:$4 sm:$0xff]   ;;  %v1245_v6 = vld [vmem:[%s1366_s29 + $0x1d0] ss:$8 sps:$4 sm:$0xff]   ;;  %v1248_v8 = vld [vmem:[%s1366_s29 + $0x1e4] ss:$8 sps:$4 sm:$0xff]  }
  0x2b   : > { %707 = vmatprep.subr.bf16.mxu0 %v1194_v22  ;;  %v1250_v9 = vld [vmem:[%s1366_s29 + $0xe0] ss:$8 sps:$4 sm:$0xff]   ;;  %v1252_v11 = vld [vmem:[%s1366_s29 + $0xf4] ss:$8 sps:$4 sm:$0xff]   ;;  %v1256_v13 = vld [vmem:[%s1366_s29 + $0xf0] ss:$8 sps:$4 sm:$0xff]  }
  0x2c   : > { %v262_v60 = vcombine.high %v254_v54, %v254_v54  ;;  %v263_v63 = vcombine.high %v261_v61, %v261_v61  ;;  %v1251_v10 = vld [vmem:[%s1366_s29 + $0x1e0] ss:$8 sps:$4 sm:$0xff]   ;;  %v1254_v12 = vld [vmem:[%s1366_s29 + $0x1f4] ss:$8 sps:$4 sm:$0xff]   ;;  %v1257_v14 = vld [vmem:[%s1366_s29 + $0x1f0] ss:$8 sps:$4 sm:$0xff]   ;;  %v268_v15 = vpack.c.bf16 %v254_v54, %v254_v54  ;;  %v270_v16 = vpack.c.bf16 %v261_v61, %v261_v61 }
  0x2d   : > { %667 = vmatpush1.bf16.msra.mxu1 %v1196_v23  ;;  %p1098_p6 = scmp.ne.s32.totalorder %s1352_s19, 3 }
  0x2e   : > { %708 = vmatpush1.bf16.msra.mxu0 %v1197_v24  ;;  %668 = vmatprep.subr.bf16.mxu1 %v1198_v25  ;;  %v269_v62 = vpack.c.bf16 %v262_v60, %v262_v60  ;;  %v271_v4 = vpack.c.bf16 %v263_v63, %v263_v63  ;;  %v1265_v37 = vld [vmem:[%s1530_s3 + $0x58] sm:$0xff] (!%p1098_p6)   ;;  %v1267_v39 = vld [vmem:[%s1530_s3 + $0x60] sm:$0xff] (!%p1098_p6)   ;;  %v1269_v43 = vld [vmem:[%s1530_s3 + $0x68] sm:$0xff] (!%p1098_p6)  }
  0x2f   : > { %709 = vmatprep.subr.bf16.mxu0 %v1200_v26  ;;  %v1266_v38 = vld [vmem:[%s1530_s3 + $0x18] sm:$0xff] (!%p1098_p6)   ;;  %v1272_v53 = vld [vmem:[%s1530_s3 + $0x30] sm:$0xff] (!%p1098_p6)   ;;  %v1099_v63 = vld [vmem:[%s1531_s4] ss:$0 sm:$0xff] (!%p1098_p6) }
  0x30   : > { %688 = vmatprep.mubr.bf16.mxu1 %v269_v62  ;;  %729 = vmatprep.mubr.bf16.mxu0 %v271_v4  ;;  %v1273_v55 = vld [vmem:[%s1530_s3 + $0x78] sm:$0xff] (!%p1098_p6)  }
  0x31   : > { %669 = vmatpush1.bf16.msra.mxu1 %v1202_v27 }
  0x32   : > { %710 = vmatpush1.bf16.msra.mxu0 %v1203_v28  ;;  %670 = vmatprep.subr.bf16.mxu1 %v1204_v29  ;;  %v244_v28 = vld [vmem:[#allocation2] sm:$0xf] }
  0x33   : > { %711 = vmatprep.subr.bf16.mxu0 %v1206_v30 }
  0x35   : > { %671 = vmatpush1.bf16.msra.mxu1 %v1208_v31  ;;  %v1259_v31 = vld [vmem:[%s1530_s3 + $0x40] sm:$0xff] (!%p1098_p6)  }
  0x36   : > { %712 = vmatpush1.bf16.msra.mxu0 %v1209_v32  ;;  %672 = vmatprep.subr.bf16.mxu1 %v1210_v33  ;;  %v1260_v32 = vld [vmem:[%s1530_s3] sm:$0xff] (!%p1098_p6)   ;;  %v1261_v33 = vld [vmem:[%s1530_s3 + $0x48] sm:$0xff] (!%p1098_p6)  }
  0x37   : > { %713 = vmatprep.subr.bf16.mxu0 %v1212_v34  ;;  %v1262_v34 = vld [vmem:[%s1530_s3 + $0x8] sm:$0xff] (!%p1098_p6)  }
  0x39   : > { %673 = vmatpush1.bf16.msra.mxu1 %v1214_v35  ;;  %v1263_v35 = vld [vmem:[%s1530_s3 + $0x50] sm:$0xff] (!%p1098_p6)  }
  0x3a   : > { %714 = vmatpush1.bf16.msra.mxu0 %v1215_v36  ;;  %674 = vmatprep.subr.bf16.mxu1 %v1216_v40  ;;  %v1264_v36 = vld [vmem:[%s1530_s3 + $0x10] sm:$0xff] (!%p1098_p6)   ;;  %v760_v40 = vsub.s32 (!%p1098_p6), 0, %v1408_v44 }
  0x3b   : > { %715 = vmatprep.subr.bf16.mxu0 %v1218_v41  ;;  %v764_v41 = vsub.s32 (!%p1098_p6), 1, %v1408_v44  ;;  %v1270_v44 = vld [vmem:[%s1530_s3 + $0x28] sm:$0xff] (!%p1098_p6)  }
  0x3d   : > { %675 = vmatpush1.bf16.msra.mxu1 %v1220_v42  ;;  %v1268_v42 = vld [vmem:[%s1530_s3 + $0x20] sm:$0xff] (!%p1098_p6)  }
  0x3e   : > { %716 = vmatpush1.bf16.msra.mxu0 %v1221_v45  ;;  %676 = vmatprep.subr.bf16.mxu1 %v1222_v46  ;;  %v756_v45 = vld [vmem:[%s1529_s2] sm:$0x3] (!%p1098_p6) }
  0x3f   : > { %717 = vmatprep.subr.bf16.mxu0 %v1224_v47  ;;  %v761_v46 = vrot.slane (!%p1098_p6), %v756_v45, %v760_v40  ;;  %v765_v47 = vrot.slane (!%p1098_p6), %v756_v45, %v764_v41 }
  0x41   : > { %677 = vmatpush1.bf16.msra.mxu1 %v1226_v48  ;;  %v766_v48 = vcombine.low (!%p1098_p6), %v761_v46, %v765_v47 }
  0x42   : > { %718 = vmatpush1.bf16.msra.mxu0 %v1227_v49  ;;  %678 = vmatprep.subr.bf16.mxu1 %v1228_v51  ;;  %v1271_v49 = vld [vmem:[%s1530_s3 + $0x70] sm:$0xff] (!%p1098_p6)  }
  0x43   : > { %719 = vmatprep.subr.bf16.mxu0 %v1230_v52  ;;  %v773_v52 = vrot.slane (!%p1098_p6), %v766_v48, %v1416_v50 }
  0x45   : > { %679 = vmatpush1.bf16.msra.mxu1 %v1232_v56 }
  0x46   : > { %720 = vmatpush1.bf16.msra.mxu0 %v1233_v57  ;;  %680 = vmatprep.subr.bf16.mxu1 %v1234_v58  ;;  %v1274_v57 = vld [vmem:[%s1530_s3 + $0x38] sm:$0xff] (!%p1098_p6)  }
  0x47   : > { %721 = vmatprep.subr.bf16.mxu0 %v1236_v59 }
  0x49   : > { %681 = vmatpush1.bf16.msra.mxu1 %v1238_v0 }
  0x4a   : > { %722 = vmatpush1.bf16.msra.mxu0 %v1239_v1  ;;  %682 = vmatprep.subr.bf16.mxu1 %v1240_v2 }
  0x4b   : > { %723 = vmatprep.subr.bf16.mxu0 %v1242_v3 }
  0x4d   : > { %683 = vmatpush1.bf16.msra.mxu1 %v1244_v5 }
  0x4e   : > { %724 = vmatpush1.bf16.msra.mxu0 %v1245_v6  ;;  %684 = vmatprep.subr.bf16.mxu1 %v1246_v7 }
  0x4f   : > { %725 = vmatprep.subr.bf16.mxu0 %v1248_v8 }
  0x51   : > { %685 = vmatpush1.bf16.msra.mxu1 %v1250_v9 }
  0x52   : > { %726 = vmatpush1.bf16.msra.mxu0 %v1251_v10  ;;  %686 = vmatprep.subr.bf16.mxu1 %v1252_v11 }
  0x53   : > { %727 = vmatprep.subr.bf16.mxu0 %v1254_v12 }
  0x55   : > { %687 = vmatpush1.bf16.msra.mxu1 %v1256_v13 }
  0x56   : > { %728 = vmatpush1.bf16.msra.mxu0 %v1257_v14 }
  0x57   : > { %1121 = vmatprep.subr.bf16.mxu0 (!%p1098_p6), %v1259_v31 }
  0x58   : > { %689 = vmatmul.mubr.bf16.vlgmr.msra.gmra.mrb[0].mxu1 %v268_v15 }
  0x59   : > { %730 = vmatmul.mubr.bf16.vlgmr.msra.gmra.mrb[0].mxu0 %v270_v16 }
  0x5a   : > { %1122 = vmatpush3.bf16.msra.mxu0 (!%p1098_p6), %v1260_v32 }
  0x5b   : > { %1123 = vmatprep.subr.bf16.mxu0 (!%p1098_p6), %v1261_v33 }
  0x5e   : > { %1124 = vmatpush3.bf16.msra.mxu0 (!%p1098_p6), %v1262_v34 }
  0x5f   : > { %1125 = vmatprep.subr.bf16.mxu0 (!%p1098_p6), %v1263_v35 }
  0x62   : > { %1126 = vmatpush3.bf16.msra.mxu0 (!%p1098_p6), %v1264_v36 }
  0x63   : > { %1127 = vmatprep.subr.bf16.mxu0 (!%p1098_p6), %v1265_v37 }
  0x66   : > { %1128 = vmatpush3.bf16.msra.mxu0 (!%p1098_p6), %v1266_v38 }
  0x67   : > { %1129 = vmatprep.subr.bf16.mxu0 (!%p1098_p6), %v1267_v39 }
  0x6a   : > { %1130 = vmatpush3.bf16.msra.mxu0 (!%p1098_p6), %v1268_v42 }
  0x6b   : > { %1131 = vmatprep.subr.bf16.mxu0 (!%p1098_p6), %v1269_v43 }
  0x6e   : > { %1132 = vmatpush3.bf16.msra.mxu0 (!%p1098_p6), %v1270_v44 }
  0x6f   : > { %1133 = vmatprep.subr.bf16.mxu0 (!%p1098_p6), %v1271_v49 }
  0x72   : > { %1134 = vmatpush3.bf16.msra.mxu0 (!%p1098_p6), %v1272_v53 }
  0x73   : > { %1135 = vmatprep.subr.bf16.mxu0 (!%p1098_p6), %v1273_v55 }
  0x76   : > { %1136 = vmatpush3.bf16.msra.mxu0 (!%p1098_p6), %v1274_v57 }
 0x12b   : > { %v690_v17 = vpop.f32.mrb[0].mxu1 }
 0x12c   : > { %v731_v18 = vpop.f32.mrb[0].mxu0  ;;  %v692_v20 = vpop.f32.mrb[1].mxu1 }
 0x12d   : > { %v732_v19 = vadd.f32 %v731_v18, %v690_v17  ;;  %v733_v21 = vpop.f32.mrb[1].mxu0  ;;  %v694_v23 = vpop.f32.mrb[2].mxu1 }
 0x12e   : > { %v734_v22 = vadd.f32 %v733_v21, %v692_v20  ;;  %v735_v24 = vpop.f32.mrb[2].mxu0  ;;  %v695_v25 = vpop.f32.mrb[3].mxu1 }
 0x12f   : > { %v736_v26 = vpop.f32.mrb[3].mxu0 }
 0x130   : > { %v740_v27 = vcombine.low %v732_v19, %v734_v22  ;;  %754 = sbr.rel (%p1098_p6) target bundleno = 547 (0x223), region = 48 }
 0x132   : > { %v747_v29 = vrot.slane %v740_v27, %v1416_v50 }
 0x134   : > { %v749_v30 = vadd.f32 %v747_v29, %v244_v28 }
 0x136   : > { %750 = vst [vmem:[#allocation2] sm:$0xf] %v749_v30 }
 0x13d   : > { %v755_v51 = vld [vmem:[#allocation2] sm:$0xf] }
 0x13e   : > { %v775_v54 = vadd.f32 %v773_v52, %v755_v51 }
 0x140   : > { %v776_v56 = vmax.f32 %v775_v54, 0.0 }
 0x142   : > { %v784_v58 = vrot.slane %v776_v56, %v1416_v50 }
 0x144   : > { %v785_v59 = vcombine.high %v784_v58, %v784_v58  ;;  %v788_v60 = vpack.c.bf16 %v784_v58, %v784_v58 }
 0x146   : > { %v789_v61 = vpack.c.bf16 %v785_v59, %v785_v59 }
 0x148   : > { %957 = vmatprep.mubr.bf16.mxu0 %v789_v61 }
 0x149   : > { %958 = vmatmul.mubr.bf16.vlgmr.msra.gmra.mrb[0].mxu0 %v788_v60 }
 0x21c   : > { %v1137_v62 = vpop.f32.mrb[0].mxu0 }
 0x21d   : > { %v1138_v0 = vpop.f32.mrb[1].mxu0 }
 0x21e   : > { %v1139_v1 = vadd.f32 %v1138_v0, %v1137_v62  ;;  %v1140_v2 = vpop.f32.mrb[2].mxu0 }
 0x21f   : > { %v1141_v3 = vpop.f32.mrb[3].mxu0 }
 0x220   : > { %v960_v4 = vadd.f32 %v1139_v1, %v1099_v63 }
 0x222   : > { %965 = vst [vmem:[#allocation3] sm:$0x3] %v960_v4 }
 0x223 PF: > { %p1149_p7 = scmp.eq.s32.totalorder %s1352_s19, 3  ;;  %s1315_s20 = smov [#allocation3]  }
 0x224   : > { %s973_s21 = sshll.u32 %s1315_s20, 4  ;;  %s974_s21 = int_to_ptr.vmem [resolvable:$true] %s973_s21 }
 0x225   : > { %s1275_s22 = scalar_lea.vmem %s974_s21, 32  ;;  %p1282_p11 = scmp.lt.s32.totalorder %s974_s21, %s974_s21 }
 0x226   : > { %p1276_p8 = scmp.ne.s32.totalorder %s974_s21, %s1275_s22  ;;  %p1283_p12 = scmp.lt.s32.totalorder %s1275_s22, %s1275_s22 }
 0x228   : > { %p1277_p9 = pnand %p1276_p8, %p1149_p7  ;;  %p1284_p13 = por %p1283_p12, %p1282_p11 }
 0x22a   : > { %p1278_p10 = pneg %p1277_p9 }
 0x22c   : > { %p1285_p0 = pnand %p1284_p13, %p1278_p10 }
 0x22e   : > { %1288 = shalt.err (!%p1285_p0)
}
 0x22f   : > { %s1289_s25 = scalar_lea.hbm %s1532_s5, 32 }
 0x230   : > { %p1290_p1 = scmp.ne.s32.totalorder %s1532_s5, %s1289_s25  ;;  %p1295_p4 = scmp.lt.u32.totalorder %s1289_s25, %s1532_s5 }
 0x232   : > { %p1291_p2 = pnand %p1290_p1, %p1149_p7 }
 0x234   : > { %p1292_p3 = pneg %p1291_p2 }
 0x236   : > { %p1297_p5 = pnand %p1295_p4, %p1292_p3 }
 0x238   : > { %1300 = shalt.err (!%p1297_p5)
}
 0x239   : > { %1146 = dma.vmem_to_hbm [thread:$0]  (%p1149_p7), %s974_s21, 32, %s1532_s5, [#allocation4]  }
 0x23a   : > { %1306 = dma.done.wait (%p1149_p7), [#allocation4], 32  }
 0x23b   : > { %1308 = vsyncadd (%p1149_p7), [#allocation4], 4294967264 }
 0x23c PF: > { %s16_s18 = sadd.s32 1, %s1311_s18  }
 0x23d   : > { %p13_p6 = scmp.ge.s32.totalorder %s16_s18, 6  }
 0x23f   :  { %15 = sbr.rel (!%p13_p6) target bundleno = 1 (0x1), region = 78 }
 0x246   :  { %986 = vsyncpa [#allocation4], 1 }
 0x247   :  { %988 = vsyncpa [#allocation4 + $0x1], 1 }

</bundles_post_ra>
